<compile_context>
chip_gen: v6e
topology: v6e:2x2x1
jax: 0.10.0
libtpu: 0.0.40
codegen_flags: <defaults>
</compile_context>

<pallas_src>
import math

import jax
import jax.numpy as jnp
from jax import lax
from jax.experimental import pallas as pl
from jax.experimental.pallas import tpu as pltpu

_SQRT_HALF = 1.0 / math.sqrt(2.0)


def _gelu_exact(x):
    # exact erf-based GELU (torch.nn.GELU() default, approximate='none')
    return 0.5 * x * (1.0 + lax.erf(x * _SQRT_HALF))


def _pointnet_kernel(xt_ref, w1_ref, b1_ref, w2_ref, b2_ref,
                     w3_ref, b3_ref, w4_ref, b4_ref, o_ref):
    B, Cin, TN = xt_ref.shape            # points of this tile live on lanes
    H1 = w1_ref.shape[0]

    xt = xt_ref[...]                     # [B, Cin, TN] f32 (lane-dense)
    w1 = w1_ref[...]                     # [H1, Cin]    f32 (torch [out, in])

    # ---- layer 1 (Cin -> H1): K=Cin is tiny, keep it off the MXU ----------
    # Feature-major [H1, TN] per batch via Cin unrolled VPU FMAs (lane axis
    # stays dense), then one small 2-D transpose back to row-major for the
    # MXU chain.  Column slices of W1 are hoisted out of the batch loop.
    w1_cols = [w1[:, c:c + 1] for c in range(Cin)]            # each [H1, 1]
    rows = []
    for b in range(B):                                        # B static & small
        xb = xt[b]                                            # [Cin, TN]
        hb_t = w1_cols[0] * xb[0:1, :]                        # [H1, TN]
        for c in range(1, Cin):
            hb_t = hb_t + w1_cols[c] * xb[c:c + 1, :]
        rows.append(jnp.transpose(hb_t))                      # [TN, H1]
    h = jnp.concatenate(rows, axis=0)                         # [B*TN, H1]
    h = _gelu_exact(h + b1_ref[...])

    # ---- layers 2..4 on the MXU: bf16 operands, f32 accumulation ----------
    h = _gelu_exact(jnp.dot(h.astype(jnp.bfloat16), w2_ref[...],
                            preferred_element_type=jnp.float32) + b2_ref[...])
    h = _gelu_exact(jnp.dot(h.astype(jnp.bfloat16), w3_ref[...],
                            preferred_element_type=jnp.float32) + b3_ref[...])
    y = jnp.dot(h.astype(jnp.bfloat16), w4_ref[...],
                preferred_element_type=jnp.float32)           # [B*TN, Dout]
    # (final bias b4 folded in once after the max)

    # ---- segmented max over this tile's points, per batch element ---------
    tile_max = jnp.concatenate(
        [jnp.max(y[b * TN:(b + 1) * TN, :], axis=0, keepdims=True)
         for b in range(B)], axis=0)                          # [B, Dout]

    t = pl.program_id(0)

    @pl.when(t == 0)
    def _init():
        o_ref[...] = jnp.full(o_ref.shape, -jnp.inf, o_ref.dtype)

    o_ref[...] = jnp.maximum(o_ref[...], tile_max)            # resident accumulator

    @pl.when(t == pl.num_programs(0) - 1)
    def _finalize():
        o_ref[...] = o_ref[...] + b4_ref[...]


def _pick_tile_n(n):
    # multiple-of-128 point tiles (lane width); a few hundred rows per step
    # fills the 256-wide MXU and amortizes per-grid-step overhead.
    for cand in (512, 384, 256, 128):
        if n % cand == 0:
            return cand
    return n   # small / odd N: single full-size tile


def pointnet_large_half_forward(x, w1, b1, w2, b2, w3, b3, w4, b4):
    """PointNetLargeHalf forward.

    x : [B, N, Cin] float32 point cloud.
    wk: torch-orientation weights [out_features, in_features], float32.
    bk: biases [out_features], float32.
    Returns [B, Dout] float32 max-pooled features (== torch.max(mlp(x), dim=1)[0]).
    """
    B, N, Cin = x.shape
    H1, H2, H3, Dout = w1.shape[0], w2.shape[0], w3.shape[0], w4.shape[0]

    # Lane-dense point layout: points on the (fast) lane axis.
    xt = jnp.transpose(x, (0, 2, 1))                          # [B, Cin, N]

    # MXU layers take [in, out] weights in bf16 (f32 accumulation in-kernel).
    w2t = w2.T.astype(jnp.bfloat16)                           # [H1, H2]
    w3t = w3.T.astype(jnp.bfloat16)                           # [H2, H3]
    w4t = w4.T.astype(jnp.bfloat16)                           # [H3, Dout]
    b1r = b1.reshape(1, H1).astype(jnp.float32)
    b2r = b2.reshape(1, H2).astype(jnp.float32)
    b3r = b3.reshape(1, H3).astype(jnp.float32)
    b4r = b4.reshape(1, Dout).astype(jnp.float32)

    tile_n = _pick_tile_n(N)
    nt = N // tile_n

    return pl.pallas_call(
        _pointnet_kernel,
        out_shape=jax.ShapeDtypeStruct((B, Dout), jnp.float32),
        grid_spec=pltpu.PrefetchScalarGridSpec(
            num_scalar_prefetch=0,
            grid=(nt,),                                        # tiles of the point axis
            in_specs=[
                pl.BlockSpec((B, Cin, tile_n), lambda t: (0, 0, t)),   # x tile
                pl.BlockSpec((H1, Cin), lambda t: (0, 0)),             # W1 (torch [out,in], f32)
                pl.BlockSpec((1, H1), lambda t: (0, 0)),               # b1
                pl.BlockSpec((H1, H2), lambda t: (0, 0)),              # W2^T (bf16)
                pl.BlockSpec((1, H2), lambda t: (0, 0)),               # b2
                pl.BlockSpec((H2, H3), lambda t: (0, 0)),              # W3^T (bf16)
                pl.BlockSpec((1, H3), lambda t: (0, 0)),               # b3
                pl.BlockSpec((H3, Dout), lambda t: (0, 0)),            # W4^T (bf16)
                pl.BlockSpec((1, Dout), lambda t: (0, 0)),             # b4
            ],
            out_specs=pl.BlockSpec((B, Dout), lambda t: (0, 0)),       # resident max accumulator
        ),
        compiler_params=pltpu.CompilerParams(
            dimension_semantics=("arbitrary",)),               # reduction over point tiles
    )(xt, w1.astype(jnp.float32), b1r, w2t, b2r, w3t, b3r, w4t, b4r)


if __name__ == "__main__":
    # Small shapes consistent with the module: point_channel=3,
    # local MLP 3 -> 64 -> 64 -> 128 -> 256, max-pool over N points.
    B, N, Cin = 2, 128, 3
    H1, H2, H3, Dout = 64, 64, 128, 256

    key = jax.random.PRNGKey(0)
    kx, k1, k2, k3, k4, kb1, kb2, kb3, kb4 = jax.random.split(key, 9)

    x = jax.random.normal(kx, (B, N, Cin), dtype=jnp.float32)

    def trunc(k, shape):   # trunc_normal_(std=0.02), torch [out, in] orientation
        return 0.02 * jax.random.truncated_normal(k, -2.0, 2.0, shape, jnp.float32)

    w1 = trunc(k1, (H1, Cin))
    w2 = trunc(k2, (H2, H1))
    w3 = trunc(k3, (H3, H2))
    w4 = trunc(k4, (Dout, H3))
    # reset_parameters_ zeroes the biases; small non-zero biases are used here
    # so the bias code paths are actually exercised by the numeric check.
    b1 = 0.02 * jax.random.normal(kb1, (H1,), jnp.float32)
    b2 = 0.02 * jax.random.normal(kb2, (H2,), jnp.float32)
    b3 = 0.02 * jax.random.normal(kb3, (H3,), jnp.float32)
    b4 = 0.02 * jax.random.normal(kb4, (Dout,), jnp.float32)

    out = pointnet_large_half_forward(x, w1, b1, w2, b2, w3, b3, w4, b4)
    out = jax.block_until_ready(out)

    # Pure-JAX f32 / exact-GELU reference (tolerance loosened slightly because
    # the kernel uses bf16 MXU operands with f32 accumulation).
    def ref(xv):
        h = _gelu_exact(xv @ w1.T + b1)
        h = _gelu_exact(h @ w2.T + b2)
        h = _gelu_exact(h @ w3.T + b3)
        y = h @ w4.T + b4
        return jnp.max(y, axis=1)

    expected = ref(x)
    assert out.shape == (B, Dout), out.shape
    max_err = float(jnp.max(jnp.abs(out - expected)))
    assert jnp.allclose(out, expected, atol=1e-3, rtol=2e-2), max_err

    print("KERNEL_OK")
</pallas_src>

<mosaic_0001>
module attributes {stable_mosaic.version = 11 : i64} {
  func.func @_pointnet_kernel(%arg0: i32, %arg1: memref<2x3x128xf32, #tpu.memory_space<vmem>>, %arg2: memref<64x3xf32, #tpu.memory_space<vmem>>, %arg3: memref<1x64xf32, #tpu.memory_space<vmem>>, %arg4: memref<64x64xbf16, #tpu.memory_space<vmem>>, %arg5: memref<1x64xf32, #tpu.memory_space<vmem>>, %arg6: memref<64x128xbf16, #tpu.memory_space<vmem>>, %arg7: memref<1x128xf32, #tpu.memory_space<vmem>>, %arg8: memref<128x256xbf16, #tpu.memory_space<vmem>>, %arg9: memref<1x256xf32, #tpu.memory_space<vmem>>, %arg10: memref<2x256xf32, #tpu.memory_space<vmem>>) attributes {dimension_semantics = [#tpu.dimension_semantics<arbitrary>], iteration_bounds = array<i64: 1>, scalar_prefetch = 0 : i64, scratch_operands = 0 : i64, tpu.core_type = #tpu.core_type<tc>, window_params = [{transform_indices = @transform_0, window_bounds = array<i64: 2, 3, 128>}, {pipeline_mode = #tpu.pipeline_mode<synchronous>, transform_indices = @transform_1, window_bounds = array<i64: 64, 3>}, {pipeline_mode = #tpu.pipeline_mode<synchronous>, transform_indices = @transform_2, window_bounds = array<i64: 1, 64>}, {pipeline_mode = #tpu.pipeline_mode<synchronous>, transform_indices = @transform_3, window_bounds = array<i64: 64, 64>}, {pipeline_mode = #tpu.pipeline_mode<synchronous>, transform_indices = @transform_4, window_bounds = array<i64: 1, 64>}, {pipeline_mode = #tpu.pipeline_mode<synchronous>, transform_indices = @transform_5, window_bounds = array<i64: 64, 128>}, {pipeline_mode = #tpu.pipeline_mode<synchronous>, transform_indices = @transform_6, window_bounds = array<i64: 1, 128>}, {pipeline_mode = #tpu.pipeline_mode<synchronous>, transform_indices = @transform_7, window_bounds = array<i64: 128, 256>}, {pipeline_mode = #tpu.pipeline_mode<synchronous>, transform_indices = @transform_8, window_bounds = array<i64: 1, 256>}, {pipeline_mode = #tpu.pipeline_mode<synchronous>, transform_indices = @transform_9, window_bounds = array<i64: 2, 256>}]} {
    %c0 = arith.constant 0 : index
    %c0_0 = arith.constant 0 : index
    %c0_1 = arith.constant 0 : index
    %0 = vector.load %arg1[%c0, %c0_0, %c0_1] : memref<2x3x128xf32, #tpu.memory_space<vmem>>, vector<2x3x128xf32>
    %c0_2 = arith.constant 0 : index
    %c0_3 = arith.constant 0 : index
    %1 = vector.load %arg2[%c0_2, %c0_3] : memref<64x3xf32, #tpu.memory_space<vmem>>, vector<64x3xf32>
    %2 = vector.extract_strided_slice %1 {offsets = [0, 0], sizes = [64, 1], strides = [1, 1]} : vector<64x3xf32> to vector<64x1xf32>
    %3 = vector.extract_strided_slice %1 {offsets = [0, 1], sizes = [64, 1], strides = [1, 1]} : vector<64x3xf32> to vector<64x1xf32>
    %4 = vector.extract_strided_slice %1 {offsets = [0, 2], sizes = [64, 1], strides = [1, 1]} : vector<64x3xf32> to vector<64x1xf32>
    %5 = vector.extract_strided_slice %0 {offsets = [0, 0, 0], sizes = [1, 3, 128], strides = [1, 1, 1]} : vector<2x3x128xf32> to vector<1x3x128xf32>
    %6 = vector.shape_cast %5 : vector<1x3x128xf32> to vector<3x128xf32>
    %7 = vector.extract_strided_slice %6 {offsets = [0, 0], sizes = [1, 128], strides = [1, 1]} : vector<3x128xf32> to vector<1x128xf32>
    %8 = vector.broadcast %2 : vector<64x1xf32> to vector<64x128xf32>
    %9 = vector.broadcast %7 : vector<1x128xf32> to vector<64x128xf32>
    %10 = arith.mulf %8, %9 : vector<64x128xf32>
    %11 = vector.extract_strided_slice %6 {offsets = [1, 0], sizes = [1, 128], strides = [1, 1]} : vector<3x128xf32> to vector<1x128xf32>
    %12 = vector.broadcast %3 : vector<64x1xf32> to vector<64x128xf32>
    %13 = vector.broadcast %11 : vector<1x128xf32> to vector<64x128xf32>
    %14 = arith.mulf %12, %13 : vector<64x128xf32>
    %15 = arith.addf %10, %14 : vector<64x128xf32>
    %16 = vector.extract_strided_slice %6 {offsets = [2, 0], sizes = [1, 128], strides = [1, 1]} : vector<3x128xf32> to vector<1x128xf32>
    %17 = vector.broadcast %4 : vector<64x1xf32> to vector<64x128xf32>
    %18 = vector.broadcast %16 : vector<1x128xf32> to vector<64x128xf32>
    %19 = arith.mulf %17, %18 : vector<64x128xf32>
    %20 = arith.addf %15, %19 : vector<64x128xf32>
    %21 = tpu.transpose %20, [1, 0] : vector<64x128xf32> -> vector<128x64xf32>
    %22 = vector.extract_strided_slice %0 {offsets = [1, 0, 0], sizes = [1, 3, 128], strides = [1, 1, 1]} : vector<2x3x128xf32> to vector<1x3x128xf32>
    %23 = vector.shape_cast %22 : vector<1x3x128xf32> to vector<3x128xf32>
    %24 = vector.extract_strided_slice %23 {offsets = [0, 0], sizes = [1, 128], strides = [1, 1]} : vector<3x128xf32> to vector<1x128xf32>
    %25 = vector.broadcast %2 : vector<64x1xf32> to vector<64x128xf32>
    %26 = vector.broadcast %24 : vector<1x128xf32> to vector<64x128xf32>
    %27 = arith.mulf %25, %26 : vector<64x128xf32>
    %28 = vector.extract_strided_slice %23 {offsets = [1, 0], sizes = [1, 128], strides = [1, 1]} : vector<3x128xf32> to vector<1x128xf32>
    %29 = vector.broadcast %3 : vector<64x1xf32> to vector<64x128xf32>
    %30 = vector.broadcast %28 : vector<1x128xf32> to vector<64x128xf32>
    %31 = arith.mulf %29, %30 : vector<64x128xf32>
    %32 = arith.addf %27, %31 : vector<64x128xf32>
    %33 = vector.extract_strided_slice %23 {offsets = [2, 0], sizes = [1, 128], strides = [1, 1]} : vector<3x128xf32> to vector<1x128xf32>
    %34 = vector.broadcast %4 : vector<64x1xf32> to vector<64x128xf32>
    %35 = vector.broadcast %33 : vector<1x128xf32> to vector<64x128xf32>
    %36 = arith.mulf %34, %35 : vector<64x128xf32>
    %37 = arith.addf %32, %36 : vector<64x128xf32>
    %38 = tpu.transpose %37, [1, 0] : vector<64x128xf32> -> vector<128x64xf32>
    %39 = tpu.concatenate %21, %38 in 0 : vector<128x64xf32>, vector<128x64xf32> -> vector<256x64xf32>
    %c0_4 = arith.constant 0 : index
    %c0_5 = arith.constant 0 : index
    %40 = vector.load %arg3[%c0_4, %c0_5] : memref<1x64xf32, #tpu.memory_space<vmem>>, vector<1x64xf32>
    %41 = vector.broadcast %40 : vector<1x64xf32> to vector<256x64xf32>
    %42 = arith.addf %39, %41 : vector<256x64xf32>
    %cst = arith.constant 5.000000e-01 : f32
    %43 = vector.broadcast %cst : f32 to vector<256x64xf32>
    %44 = arith.mulf %43, %42 : vector<256x64xf32>
    %cst_6 = arith.constant 0.707106769 : f32
    %45 = vector.broadcast %cst_6 : f32 to vector<256x64xf32>
    %46 = arith.mulf %42, %45 : vector<256x64xf32>
    %47 = math.erf %46 : vector<256x64xf32>
    %cst_7 = arith.constant 1.000000e+00 : f32
    %48 = vector.broadcast %cst_7 : f32 to vector<256x64xf32>
    %49 = arith.addf %48, %47 : vector<256x64xf32>
    %50 = arith.mulf %44, %49 : vector<256x64xf32>
    %51 = arith.truncf %50 : vector<256x64xf32> to vector<256x64xbf16>
    %c0_8 = arith.constant 0 : index
    %c0_9 = arith.constant 0 : index
    %52 = vector.load %arg4[%c0_8, %c0_9] : memref<64x64xbf16, #tpu.memory_space<vmem>>, vector<64x64xbf16>
    %cst_10 = arith.constant dense<0.000000e+00> : vector<256x64xf32>
    %53 = tpu.matmul %51, %52, %cst_10 {dimension_numbers = #tpu.dot_dimension_numbers<[1], [0], [0], [1], [0, 0, 1, 1], [], []>} : vector<256x64xbf16>, vector<64x64xbf16>, vector<256x64xf32> -> vector<256x64xf32>
    %c0_11 = arith.constant 0 : index
    %c0_12 = arith.constant 0 : index
    %54 = vector.load %arg5[%c0_11, %c0_12] : memref<1x64xf32, #tpu.memory_space<vmem>>, vector<1x64xf32>
    %55 = vector.broadcast %54 : vector<1x64xf32> to vector<256x64xf32>
    %56 = arith.addf %53, %55 : vector<256x64xf32>
    %cst_13 = arith.constant 5.000000e-01 : f32
    %57 = vector.broadcast %cst_13 : f32 to vector<256x64xf32>
    %58 = arith.mulf %57, %56 : vector<256x64xf32>
    %cst_14 = arith.constant 0.707106769 : f32
    %59 = vector.broadcast %cst_14 : f32 to vector<256x64xf32>
    %60 = arith.mulf %56, %59 : vector<256x64xf32>
    %61 = math.erf %60 : vector<256x64xf32>
    %cst_15 = arith.constant 1.000000e+00 : f32
    %62 = vector.broadcast %cst_15 : f32 to vector<256x64xf32>
    %63 = arith.addf %62, %61 : vector<256x64xf32>
    %64 = arith.mulf %58, %63 : vector<256x64xf32>
    %65 = arith.truncf %64 : vector<256x64xf32> to vector<256x64xbf16>
    %c0_16 = arith.constant 0 : index
    %c0_17 = arith.constant 0 : index
    %66 = vector.load %arg6[%c0_16, %c0_17] : memref<64x128xbf16, #tpu.memory_space<vmem>>, vector<64x128xbf16>
    %cst_18 = arith.constant dense<0.000000e+00> : vector<256x128xf32>
    %67 = tpu.matmul %65, %66, %cst_18 {dimension_numbers = #tpu.dot_dimension_numbers<[1], [0], [0], [1], [0, 0, 1, 1], [], []>} : vector<256x64xbf16>, vector<64x128xbf16>, vector<256x128xf32> -> vector<256x128xf32>
    %c0_19 = arith.constant 0 : index
    %c0_20 = arith.constant 0 : index
    %68 = vector.load %arg7[%c0_19, %c0_20] : memref<1x128xf32, #tpu.memory_space<vmem>>, vector<1x128xf32>
    %69 = vector.broadcast %68 : vector<1x128xf32> to vector<256x128xf32>
    %70 = arith.addf %67, %69 : vector<256x128xf32>
    %cst_21 = arith.constant 5.000000e-01 : f32
    %71 = vector.broadcast %cst_21 : f32 to vector<256x128xf32>
    %72 = arith.mulf %71, %70 : vector<256x128xf32>
    %cst_22 = arith.constant 0.707106769 : f32
    %73 = vector.broadcast %cst_22 : f32 to vector<256x128xf32>
    %74 = arith.mulf %70, %73 : vector<256x128xf32>
    %75 = math.erf %74 : vector<256x128xf32>
    %cst_23 = arith.constant 1.000000e+00 : f32
    %76 = vector.broadcast %cst_23 : f32 to vector<256x128xf32>
    %77 = arith.addf %76, %75 : vector<256x128xf32>
    %78 = arith.mulf %72, %77 : vector<256x128xf32>
    %79 = arith.truncf %78 : vector<256x128xf32> to vector<256x128xbf16>
    %c0_24 = arith.constant 0 : index
    %c0_25 = arith.constant 0 : index
    %80 = vector.load %arg8[%c0_24, %c0_25] : memref<128x256xbf16, #tpu.memory_space<vmem>>, vector<128x256xbf16>
    %cst_26 = arith.constant dense<0.000000e+00> : vector<256x256xf32>
    %81 = tpu.matmul %79, %80, %cst_26 {dimension_numbers = #tpu.dot_dimension_numbers<[1], [0], [0], [1], [0, 0, 1, 1], [], []>} : vector<256x128xbf16>, vector<128x256xbf16>, vector<256x256xf32> -> vector<256x256xf32>
    %82 = vector.extract_strided_slice %81 {offsets = [0, 0], sizes = [128, 256], strides = [1, 1]} : vector<256x256xf32> to vector<128x256xf32>
    %cst_27 = arith.constant dense<0xFF800000> : vector<256xf32>
    %83 = vector.multi_reduction <maximumf>, %82, %cst_27 [0] : vector<128x256xf32> to vector<256xf32>
    %84 = vector.shape_cast %83 : vector<256xf32> to vector<1x256xf32>
    %85 = vector.extract_strided_slice %81 {offsets = [128, 0], sizes = [128, 256], strides = [1, 1]} : vector<256x256xf32> to vector<128x256xf32>
    %cst_28 = arith.constant dense<0xFF800000> : vector<256xf32>
    %86 = vector.multi_reduction <maximumf>, %85, %cst_28 [0] : vector<128x256xf32> to vector<256xf32>
    %87 = vector.shape_cast %86 : vector<256xf32> to vector<1x256xf32>
    %88 = tpu.concatenate %84, %87 in 0 : vector<1x256xf32>, vector<1x256xf32> -> vector<2x256xf32>
    %c0_i32 = arith.constant 0 : i32
    %89 = arith.cmpi eq, %arg0, %c0_i32 : i32
    %90 = arith.extui %89 : i1 to i32
    %c0_i32_29 = arith.constant 0 : i32
    %91 = arith.cmpi ne, %90, %c0_i32_29 : i32
    scf.if %91 {
      %cst_36 = arith.constant 0xFF800000 : f32
      %98 = vector.broadcast %cst_36 : f32 to vector<2x256xf32>
      %c0_37 = arith.constant 0 : index
      %c0_38 = arith.constant 0 : index
      %99 = vector.load %arg10[%c0_37, %c0_38] : memref<2x256xf32, #tpu.memory_space<vmem>>, vector<2x256xf32>
      tpu.vector_store %arg10[%c0_37, %c0_38], %98 {strides = array<i32>} : memref<2x256xf32, #tpu.memory_space<vmem>>, vector<2x256xf32>,
    } else {
    }
    %c0_30 = arith.constant 0 : index
    %c0_31 = arith.constant 0 : index
    %92 = vector.load %arg10[%c0_30, %c0_31] : memref<2x256xf32, #tpu.memory_space<vmem>>, vector<2x256xf32>
    %93 = arith.maximumf %92, %88 : vector<2x256xf32>
    %c0_32 = arith.constant 0 : index
    %c0_33 = arith.constant 0 : index
    %94 = vector.load %arg10[%c0_32, %c0_33] : memref<2x256xf32, #tpu.memory_space<vmem>>, vector<2x256xf32>
    tpu.vector_store %arg10[%c0_32, %c0_33], %93 {strides = array<i32>} : memref<2x256xf32, #tpu.memory_space<vmem>>, vector<2x256xf32>,
    %c0_i32_34 = arith.constant 0 : i32
    %95 = arith.cmpi eq, %arg0, %c0_i32_34 : i32
    %96 = arith.extui %95 : i1 to i32
    %c0_i32_35 = arith.constant 0 : i32
    %97 = arith.cmpi ne, %96, %c0_i32_35 : i32
    scf.if %97 {
      %c0_36 = arith.constant 0 : index
      %c0_37 = arith.constant 0 : index
      %98 = vector.load %arg10[%c0_36, %c0_37] : memref<2x256xf32, #tpu.memory_space<vmem>>, vector<2x256xf32>
      %c0_38 = arith.constant 0 : index
      %c0_39 = arith.constant 0 : index
      %99 = vector.load %arg9[%c0_38, %c0_39] : memref<1x256xf32, #tpu.memory_space<vmem>>, vector<1x256xf32>
      %100 = vector.broadcast %99 : vector<1x256xf32> to vector<2x256xf32>
      %101 = arith.addf %98, %100 : vector<2x256xf32>
      %c0_40 = arith.constant 0 : index
      %c0_41 = arith.constant 0 : index
      %102 = vector.load %arg10[%c0_40, %c0_41] : memref<2x256xf32, #tpu.memory_space<vmem>>, vector<2x256xf32>
      tpu.vector_store %arg10[%c0_40, %c0_41], %101 {strides = array<i32>} : memref<2x256xf32, #tpu.memory_space<vmem>>, vector<2x256xf32>,
    } else {
    }
    return
  }
  func.func @transform_0(%arg0: i32) -> (i32, i32, i32) {
    %c0_i32 = arith.constant 0 : i32
    %c0_i32_0 = arith.constant 0 : i32
    %c0_i32_1 = arith.constant 0 : i32
    return %c0_i32, %c0_i32_0, %arg0 : i32, i32, i32
  }
  func.func @transform_1(%arg0: i32) -> (i32, i32) {
    %c0_i32 = arith.constant 0 : i32
    %c0_i32_0 = arith.constant 0 : i32
    %c0_i32_1 = arith.constant 0 : i32
    return %c0_i32, %c0_i32_0 : i32, i32
  }
  func.func @transform_2(%arg0: i32) -> (i32, i32) {
    %c0_i32 = arith.constant 0 : i32
    %c0_i32_0 = arith.constant 0 : i32
    %c0_i32_1 = arith.constant 0 : i32
    return %c0_i32, %c0_i32_0 : i32, i32
  }
  func.func @transform_3(%arg0: i32) -> (i32, i32) {
    %c0_i32 = arith.constant 0 : i32
    %c0_i32_0 = arith.constant 0 : i32
    %c0_i32_1 = arith.constant 0 : i32
    return %c0_i32, %c0_i32_0 : i32, i32
  }
  func.func @transform_4(%arg0: i32) -> (i32, i32) {
    %c0_i32 = arith.constant 0 : i32
    %c0_i32_0 = arith.constant 0 : i32
    %c0_i32_1 = arith.constant 0 : i32
    return %c0_i32, %c0_i32_0 : i32, i32
  }
  func.func @transform_5(%arg0: i32) -> (i32, i32) {
    %c0_i32 = arith.constant 0 : i32
    %c0_i32_0 = arith.constant 0 : i32
    %c0_i32_1 = arith.constant 0 : i32
    return %c0_i32, %c0_i32_0 : i32, i32
  }
  func.func @transform_6(%arg0: i32) -> (i32, i32) {
    %c0_i32 = arith.constant 0 : i32
    %c0_i32_0 = arith.constant 0 : i32
    %c0_i32_1 = arith.constant 0 : i32
    return %c0_i32, %c0_i32_0 : i32, i32
  }
  func.func @transform_7(%arg0: i32) -> (i32, i32) {
    %c0_i32 = arith.constant 0 : i32
    %c0_i32_0 = arith.constant 0 : i32
    %c0_i32_1 = arith.constant 0 : i32
    return %c0_i32, %c0_i32_0 : i32, i32
  }
  func.func @transform_8(%arg0: i32) -> (i32, i32) {
    %c0_i32 = arith.constant 0 : i32
    %c0_i32_0 = arith.constant 0 : i32
    %c0_i32_1 = arith.constant 0 : i32
    return %c0_i32, %c0_i32_0 : i32, i32
  }
  func.func @transform_9(%arg0: i32) -> (i32, i32) {
    %c0_i32 = arith.constant 0 : i32
    %c0_i32_0 = arith.constant 0 : i32
    %c0_i32_1 = arith.constant 0 : i32
    return %c0_i32, %c0_i32_0 : i32, i32
  }
}

</mosaic_0001>

<bundles_post_ra>
// kernel: tpu_custom_call.1
= control target key start
LH: loop header
LB: loop body
LE: loop exit
PB: predicated region body
PF: predicated region fallthrough
CT: control target
= control target key end

     0   :  { %14 = vsyncpa [#allocation3], 0  ;;  %s2957_s0 = inlined_call_operand.vmem [shape: f32[2,3,128], index: 0, kind: input, shape index: {}]   ;;  %s2958_s1 = inlined_call_operand.vmem [shape: f32[64,3], index: 1, kind: input, shape index: {}]   ;;  %s2959_s2 = inlined_call_operand.vmem [shape: f32[1,64], index: 2, kind: input, shape index: {}]   ;;  %s2960_s3 = inlined_call_operand.vmem [shape: bf16[64,64], index: 3, kind: input, shape index: {}]   ;;  %s2961_s4 = inlined_call_operand.vmem [shape: f32[1,64], index: 4, kind: input, shape index: {}]   ;;  %s2962_s5 = inlined_call_operand.vmem [shape: bf16[64,128], index: 5, kind: input, shape index: {}]   ;;  %s2963_s6 = inlined_call_operand.vmem [shape: f32[1,128], index: 6, kind: input, shape index: {}]   ;;  %s2964_s7 = inlined_call_operand.hbm [shape: bf16[128,256], index: 7, kind: input, shape index: {}]   ;;  %s2965_s8 = inlined_call_operand.vmem [shape: f32[1,256], index: 8, kind: input, shape index: {}]   ;;  %s2966_s9 = inlined_call_operand.hbm [shape: f32[2,256], index: 9, kind: output, shape index: {}]  }
   0x1   :  { %15 = vsyncpa [#allocation4], 0  ;;  %s2320_s30 = smov [#allocation2]  }
   0x2   :  { %s35_s10 = sshll.u32 %s2320_s30, 4  ;;  %s36_s10 = int_to_ptr.vmem [resolvable:$true] %s35_s10 }
   0x3   :  { %s2284_s11 = scalar_lea.vmem %s36_s10, 2048  ;;  %p2289_p1 = scmp.lt.s32.totalorder %s36_s10, %s36_s10 }
   0x4   :  { %p2285_p0 = scmp.ne.s32.totalorder %s36_s10, %s2284_s11  ;;  %p2290_p2 = scmp.lt.s32.totalorder %s2284_s11, %s2284_s11 }
   0x6   :  { %p2291_p3 = por %p2290_p2, %p2289_p1 }
   0x8   :  { %p2292_p4 = pnand %p2291_p3, %p2285_p0 }
   0xa   :  { %2295 = shalt.err (!%p2292_p4)
}
   0xb   :  { %s2321_s12 = smov 128   ;;  %s2322_s13 = smov 8  }
   0xc   :  { %41 = dma.hbm_to_vmem [thread:$0]  %s2964_s7, 2048, %s36_s10, [#allocation3], %s2321_s12, %s2321_s12, %s2322_s13  }
   0xd   :  { %2316 = dma.done.wait [#allocation3], 2048  }
   0xe   :  { %2317 = vsyncadd [#allocation3], 4294965248  ;;  %v2323_v0 = vmov 2   ;;  %v2324_v1 = vmov 0   ;;  %v52_v2 = vld [vmem:[%s2958_s1 + $0x10] sm:$0xff]  ;;  %v51_v3 = vld [vmem:[%s2958_s1 + $0x8] sm:$0xff]  ;;  %v98_v15 = vlaneseq }
   0xf   :  { %2040 = vset.pattern.permute.xlu0 %v2323_v0  ;;  %2034 = vset.pattern.permute.xlu1 %v2324_v1  ;;  %v53_v4 = vld [vmem:[%s2958_s1 + $0x18] sm:$0xff]  ;;  %v2325_v5 = vmov 1   ;;  %v50_v6 = vld [vmem:[%s2958_s1] sm:$0xff]  ;;  %v55_v7 = vld [vmem:[%s2958_s1 + $0x28] sm:$0xff]  ;;  %vm584_vm0 = vcmask 523264   ;;  %vm1767_vm1 = vcmask 1040384  }
  0x10   :  { %171 = vperm.xlu0 %2040, %v52_v2   ;;  %65 = vperm.xlu1 %2034, %v51_v3   ;;  %v56_v8 = vld [vmem:[%s2958_s1 + $0x30] sm:$0xff]  ;;  %v54_v9 = vld [vmem:[%s2958_s1 + $0x20] sm:$0xff]  ;;  %v57_v10 = vld [vmem:[%s2958_s1 + $0x38] sm:$0xff]  ;;  %v2413_v18 = vshrl.u32 %v98_v15, 7  ;;  %s2328_s30 = smov [#allocation5]  }
  0x11   :  { %v48_v24 = vld [vmem:[%s2957_s0] sm:$0x7]  ;;  %v49_v26 = vld [vmem:[%s2957_s0 + $0x4] sm:$0x7]  ;;  %s1820_s1 = sshll.u32 %s2328_s30, 4  ;;  %s1821_s1 = int_to_ptr.vmem [resolvable:$true] %s1820_s1 }
  0x12   :  { %2970 = vst [vmem:[#allocation8_spill] sm:$0xff] %v2413_v18  ;;  %v2418_v20 = vsub.s32 1, %v2413_v18  ;;  %v2421_v22 = vsub.s32 0, %v2413_v18  ;;  %v196_v23 = vsub.s32 2, %v2413_v18  ;;  %s2296_s10 = scalar_lea.vmem %s1821_s1, 64  ;;  %p2301_p6 = scmp.lt.s32.totalorder %s1821_s1, %s1821_s1 }
  0x13   :  { %p2297_p5 = scmp.ne.s32.totalorder %s1821_s1, %s2296_s10  ;;  %p2302_p7 = scmp.lt.s32.totalorder %s2296_s10, %s2296_s10 }
  0x14   :  { %175 = vperm.xlu0 %2040, %v53_v4   ;;  %2035 = vset.pattern.permute.xlu1 %v2325_v5  ;;  %2971 = vst [vmem:[#allocation9_spill] sm:$0xff] %v2418_v20  ;;  %2972 = vst [vmem:[#allocation10_spill] sm:$0xff] %v2421_v22  ;;  %v2433_v27 = vrot.slane %v48_v24, %v2418_v20  ;;  %v2436_v28 = vrot.slane %v49_v26, %v2418_v20 }
  0x15   :  { %115 = vperm.xlu1 %2035, %v51_v3   ;;  %v2439_v29 = vrot.slane %v48_v24, %v2421_v22  ;;  %v2441_v30 = vrot.slane %v48_v24, %v196_v23  ;;  %v2444_v32 = vrot.slane %v49_v26, %v2421_v22  ;;  %v2446_v33 = vrot.slane %v49_v26, %v196_v23  ;;  %p2303_p8 = por %p2302_p7, %p2301_p6 }
  0x17   :  { %p2304_p9 = pnand %p2303_p8, %p2297_p5 }
  0x18   :  { %2043 = vset.pattern.permute.xlu0 %v2325_v5 }
  0x19   :  { %2036 = vset.pattern.permute.xlu1 %v2323_v0  ;;  %111 = vperm.xlu0 %2043, %v50_v6  }
  0x1a   :  { %163 = vperm.xlu1 %2036, %v50_v6  }
  0x1d   :  { %131 = vperm.xlu0 %2043, %v55_v7  }
  0x1e   :  { %2037 = vset.pattern.permute.xlu1 %v2325_v5 }
  0x1f   :  { %119 = vperm.xlu1 %2037, %v52_v2  }
  0x21   :  { %135 = vperm.xlu0 %2043, %v56_v8  }
  0x23   :  { %2038 = vset.pattern.permute.xlu1 %v2323_v0 }
  0x24   :  { %167 = vperm.xlu1 %2038, %v51_v3  }
  0x25   :  { %2047 = vset.pattern.permute.xlu0 %v2324_v1 }
  0x26   :  { %60 = vperm.xlu0 %2047, %v50_v6  }
  0x28   :  { %2039 = vset.pattern.permute.xlu1 %v2325_v5 }
  0x29   :  { %123 = vperm.xlu1 %2039, %v53_v4  }
  0x2a   :  { %70 = vperm.xlu0 %2047, %v52_v2  }
  0x2d   :  { %2041 = vset.pattern.permute.xlu1 %v2324_v1 }
  0x2e   :  { %75 = vperm.xlu0 %2047, %v53_v4   ;;  %80 = vperm.xlu1 %2041, %v54_v9  }
  0x32   :  { %2042 = vset.pattern.permute.xlu1 %v2325_v5  ;;  %95 = vperm.xlu0 %2047, %v57_v10  }
  0x33   :  { %127 = vperm.xlu1 %2042, %v54_v9  }
  0x36   :  { %2051 = vset.pattern.permute.xlu0 %v2323_v0 }
  0x37   :  { %2044 = vset.pattern.permute.xlu1 %v2324_v1  ;;  %191 = vperm.xlu0 %2051, %v57_v10  }
  0x38   :  { %85 = vperm.xlu1 %2044, %v55_v7  }
  0x3c   :  { %2045 = vset.pattern.permute.xlu1 %v2323_v0 }
  0x3d   :  { %179 = vperm.xlu1 %2045, %v54_v9  }
  0x41   :  { %2046 = vset.pattern.permute.xlu1 %v2324_v1 }
  0x42   :  { %90 = vperm.xlu1 %2046, %v56_v8  }
  0x46   :  { %2048 = vset.pattern.permute.xlu1 %v2323_v0 }
  0x47   :  { %183 = vperm.xlu1 %2048, %v55_v7  }
  0x4b   :  { %2049 = vset.pattern.permute.xlu1 %v2325_v5 }
  0x4c   :  { %139 = vperm.xlu1 %2049, %v57_v10  }
  0x50   :  { %2050 = vset.pattern.permute.xlu1 %v2323_v0 }
  0x51   :  { %187 = vperm.xlu1 %2050, %v56_v8  }
  0x8b   :  { %v66_v11 = vpop.permute.xlu1 %65  ;;  %v172_v12 = vpop.permute.xlu0 %171 }
  0x8c   :  { %v103_v46 = vmul.f32 %v2439_v29, %v66_v11  ;;  %v251_v47 = vmul.f32 %v2444_v32, %v66_v11  ;;  %v200_v4 = vmul.f32 %v2441_v30, %v172_v12  ;;  %v284_v5 = vmul.f32 %v2446_v33, %v172_v12 }
  0x8f   :  { %v2411_v13 = vpop.permute.xlu0 %175 }
  0x90   :  { %v116_v14 = vpop.permute.xlu1 %115  ;;  %v201_v15 = vmul.f32 %v2441_v30, %v2411_v13 }
  0x91   :  { %v147_v39 = vmul.f32 %v2433_v27, %v116_v14  ;;  %v263_v40 = vmul.f32 %v2436_v28, %v116_v14 }
  0x93   :  { %v155_v55 = vadd.f32 %v147_v39, %v103_v46  ;;  %v271_v56 = vadd.f32 %v263_v40, %v251_v47 }
  0x94   :  { %v112_v16 = vpop.permute.xlu0 %111 }
  0x95   :  { %v164_v17 = vpop.permute.xlu1 %163  ;;  %v146_v34 = vmul.f32 %v2433_v27, %v112_v16  ;;  %v262_v35 = vmul.f32 %v2436_v28, %v112_v16  ;;  %v285_v16 = vmul.f32 %v2446_v33, %v2411_v13 }
  0x96   :  { %v198_v41 = vmul.f32 %v2441_v30, %v164_v17  ;;  %v282_v42 = vmul.f32 %v2446_v33, %v164_v17 }
  0x98   :  { %v2415_v19 = vpop.permute.xlu0 %131 }
  0x9a   :  { %v120_v21 = vpop.permute.xlu1 %119 }
  0x9b   :  { %v148_v57 = vmul.f32 %v2433_v27, %v120_v21  ;;  %v264_v58 = vmul.f32 %v2436_v28, %v120_v21 }
  0x9c   :  { %v2427_v25 = vpop.permute.xlu0 %135 }
  0x9f   :  { %v168_v31 = vpop.permute.xlu1 %167 }
  0xa0   :  { %v199_v48 = vmul.f32 %v2441_v30, %v168_v31  ;;  %v283_v49 = vmul.f32 %v2446_v33, %v168_v31 }
  0xa1   :  { %v61_v36 = vpop.permute.xlu0 %60 }
  0xa2   :  { %v102_v37 = vmul.f32 %v2439_v29, %v61_v36  ;;  %v250_v38 = vmul.f32 %v2444_v32, %v61_v36  ;;  %v207_v59 = vadd.f32 %v199_v48, %v155_v55  ;;  %v291_v60 = vadd.f32 %v283_v49, %v271_v56 }
  0xa3   :  { %v152_v56 = vmul.f32 %v2433_v27, %v2427_v25 }
  0xa4   :  { %v154_v43 = vadd.f32 %v146_v34, %v102_v37  ;;  %v270_v44 = vadd.f32 %v262_v35, %v250_v38  ;;  %v124_v45 = vpop.permute.xlu1 %123 }
  0xa5   :  { %v71_v50 = vpop.permute.xlu0 %70  ;;  %v149_v6 = vmul.f32 %v2433_v27, %v124_v45  ;;  %v265_v7 = vmul.f32 %v2436_v28, %v124_v45 }
  0xa6   :  { %v104_v51 = vmul.f32 %v2439_v29, %v71_v50  ;;  %v252_v52 = vmul.f32 %v2444_v32, %v71_v50  ;;  %v290_v53 = vadd.f32 %v282_v42, %v270_v44  ;;  %v206_v54 = vadd.f32 %v198_v41, %v154_v43 }
  0xa7   :  { %v151_v43 = vmul.f32 %v2433_v27, %v2415_v19  ;;  %v267_v44 = vmul.f32 %v2436_v28, %v2415_v19  ;;  %v2052_v19 = vld [vmem:[%s2960_s3 + $0x18] sm:$0xff]  }
  0xa8   :  { %298 = vxpose.xlu0.b32.start [1/8] (short) %v290_v53, 128  ;;  %214 = vxpose.xlu1.b32.start [1/8] (short) %v206_v54, 128  ;;  %v156_v63 = vadd.f32 %v148_v57, %v104_v51  ;;  %v272_v0 = vadd.f32 %v264_v58, %v252_v52  ;;  %v268_v57 = vmul.f32 %v2436_v28, %v2427_v25  ;;  %v2053_v25 = vld [vmem:[%s2960_s3 + $0x10] sm:$0xff]  }
  0xa9   :  { %v76_v61 = vpop.permute.xlu0 %75  ;;  %v81_v62 = vpop.permute.xlu1 %80  ;;  %1928 = vmatprep.subr.bf16.mxu0 %v2052_v19 }
  0xaa   :  { %v105_v2 = vmul.f32 %v2439_v29, %v76_v61  ;;  %v253_v3 = vmul.f32 %v2444_v32, %v76_v61  ;;  %v208_v8 = vadd.f32 %v200_v4, %v156_v63  ;;  %v292_v9 = vadd.f32 %v284_v5, %v272_v0  ;;  %1929 = vmatpush3.bf16.msra.mxu0 %v2052_v19 }
  0xab   :  { %v106_v26 = vmul.f32 %v2439_v29, %v81_v62  ;;  %v254_v31 = vmul.f32 %v2444_v32, %v81_v62  ;;  %1930 = vmatprep.subr.bf16.mxu0 %v2053_v25 }
  0xac   :  { %299 = vxpose.xlu0.b32.cont [2/8] (short) %v291_v60, 128  ;;  %215 = vxpose.xlu1.b32.cont [2/8] (short) %v207_v59, 128  ;;  %v157_v10 = vadd.f32 %v149_v6, %v105_v2  ;;  %v273_v11 = vadd.f32 %v265_v7, %v253_v3  ;;  %v2054_v7 = vld [vmem:[%s2960_s3 + $0x8] sm:$0xff]  }
  0xad   :  { %v96_v52 = vpop.permute.xlu0 %95 }
  0xae   :  { %v128_v14 = vpop.permute.xlu1 %127  ;;  %v209_v12 = vadd.f32 %v201_v15, %v157_v10  ;;  %v293_v17 = vadd.f32 %v285_v16, %v273_v11  ;;  %v109_v61 = vmul.f32 %v2439_v29, %v96_v52  ;;  %v257_v62 = vmul.f32 %v2444_v32, %v96_v52  ;;  %1931 = vmatpush3.bf16.msra.mxu0 %v2053_v25 }
  0xaf   :  { %v150_v23 = vmul.f32 %v2433_v27, %v128_v14  ;;  %v266_v24 = vmul.f32 %v2436_v28, %v128_v14  ;;  %1932 = vmatprep.subr.bf16.mxu0 %v2054_v7 }
  0xb0   :  { %300 = vxpose.xlu0.b32.cont [3/8] (short) %v292_v9, 128  ;;  %216 = vxpose.xlu1.b32.cont [3/8] (short) %v208_v8, 128 }
  0xb1   :  { %v158_v35 = vadd.f32 %v150_v23, %v106_v26  ;;  %v274_v36 = vadd.f32 %v266_v24, %v254_v31 }
  0xb2   :  { %v192_v60 = vpop.permute.xlu0 %191  ;;  %1933 = vmatpush3.bf16.msra.mxu0 %v2054_v7 }
  0xb3   :  { %v86_v21 = vpop.permute.xlu1 %85 }
  0xb4   :  { %301 = vxpose.xlu0.b32.cont [4/8] (short) %v293_v17, 128  ;;  %217 = vxpose.xlu1.b32.cont [4/8] (short) %v209_v12, 128  ;;  %v107_v41 = vmul.f32 %v2439_v29, %v86_v21  ;;  %v255_v42 = vmul.f32 %v2444_v32, %v86_v21 }
  0xb6   :  { %v159_v46 = vadd.f32 %v151_v43, %v107_v41  ;;  %v275_v47 = vadd.f32 %v267_v44, %v255_v42 }
  0xb8   :  { %v180_v34 = vpop.permute.xlu1 %179 }
  0xb9   :  { %v202_v13 = vmul.f32 %v2441_v30, %v180_v34  ;;  %v286_v37 = vmul.f32 %v2446_v33, %v180_v34 }
  0xbb   :  { %v210_v38 = vadd.f32 %v202_v13, %v158_v35  ;;  %v294_v39 = vadd.f32 %v286_v37, %v274_v36 }
  0xbd   :  { %v91_v40 = vpop.permute.xlu1 %90  ;;  %302 = vxpose.xlu0.b32.cont [5/8] (short) %v294_v39, 128  ;;  %218 = vxpose.xlu1.b32.cont [5/8] (short) %v210_v38, 128 }
  0xbe   :  { %v108_v54 = vmul.f32 %v2439_v29, %v91_v40  ;;  %v256_v55 = vmul.f32 %v2444_v32, %v91_v40 }
  0xc0   :  { %v160_v0 = vadd.f32 %v152_v56, %v108_v54  ;;  %v276_v2 = vadd.f32 %v268_v57, %v256_v55 }
  0xc2   :  { %v184_v45 = vpop.permute.xlu1 %183 }
  0xc3   :  { %v203_v48 = vmul.f32 %v2441_v30, %v184_v45  ;;  %v287_v49 = vmul.f32 %v2446_v33, %v184_v45 }
  0xc5   :  { %v211_v50 = vadd.f32 %v203_v48, %v159_v46  ;;  %v295_v51 = vadd.f32 %v287_v49, %v275_v47 }
  0xc7   :  { %v140_v53 = vpop.permute.xlu1 %139  ;;  %303 = vxpose.xlu0.b32.cont [6/8] (short) %v295_v51, 128  ;;  %219 = vxpose.xlu1.b32.cont [6/8] (short) %v211_v50, 128 }
  0xc8   :  { %v153_v58 = vmul.f32 %v2433_v27, %v140_v53  ;;  %v269_v59 = vmul.f32 %v2436_v28, %v140_v53  ;;  %v205_v27 = vmul.f32 %v2441_v30, %v192_v60  ;;  %v289_v28 = vmul.f32 %v2446_v33, %v192_v60 }
  0xca   :  { %v161_v5 = vadd.f32 %v153_v58, %v109_v61  ;;  %v277_v29 = vadd.f32 %v269_v59, %v257_v62 }
  0xcc   :  { %v188_v63 = vpop.permute.xlu1 %187  ;;  %v213_v8 = vadd.f32 %v205_v27, %v161_v5  ;;  %v297_v9 = vadd.f32 %v289_v28, %v277_v29 }
  0xcd   :  { %v204_v3 = vmul.f32 %v2441_v30, %v188_v63  ;;  %v288_v4 = vmul.f32 %v2446_v33, %v188_v63  ;;  %v2055_v30 = vld [vmem:[%s2960_s3] sm:$0xff]  }
  0xce   :  { %1934 = vmatprep.subr.bf16.mxu0 %v2055_v30  ;;  %v2517_v33 = vld [vmem:[%s2959_s2] ss:$0 sm:$0xff] }
  0xcf   :  { %v212_v6 = vadd.f32 %v204_v3, %v160_v0  ;;  %v296_v32 = vadd.f32 %v288_v4, %v276_v2  ;;  %1935 = vmatpush3.bf16.msra.mxu0 %v2055_v30 }
  0xd1   :  { %304 = vxpose.xlu0.b32.cont [7/8] (short) %v296_v32, 128  ;;  %220 = vxpose.xlu1.b32.cont [7/8] (short) %v212_v6, 128 }
  0xd5   :  { %305 = vxpose.xlu0.b32.end [8/8] (short) %v297_v9, 128  ;;  %221 = vxpose.xlu1.b32.end [8/8] (short) %v213_v8, 128 }
 0x135   :  { %v230_v10 = vpop.trf.xlu1  ;;  %v2519_v11 = vpop.trf.xlu0 }
 0x136   :  { %v337_v14 = vadd.f32 %v2517_v33, %v230_v10 }
 0x138   :  { %v401_v15 = vmul.f32 0.70710677, %v337_v14  ;;  %v369_v47 = vmul.f32 0.5, %v337_v14 }
 0x139   :  { %v231_v16 = vpop.trf.xlu1  ;;  %v2522_v12 = vpop.trf.xlu0 }
 0x13a   :  { %2084 = verf.f32 %v401_v15  ;;  %v338_v17 = vadd.f32 %v2517_v33, %v231_v16 }
 0x13c   :  { %v402_v21 = vmul.f32 0.70710677, %v338_v17  ;;  %v370_v48 = vmul.f32 0.5, %v338_v17 }
 0x13d   :  { %v232_v23 = vpop.trf.xlu1  ;;  %v2525_v24 = vpop.trf.xlu0 }
 0x13e   :  { %2086 = verf.f32 %v402_v21  ;;  %v339_v26 = vadd.f32 %v2517_v33, %v232_v23 }
 0x140   :  { %v403_v31 = vmul.f32 0.70710677, %v339_v26  ;;  %v371_v63 = vmul.f32 0.5, %v339_v26 }
 0x141   :  { %v233_v34 = vpop.trf.xlu1  ;;  %v2528_v35 = vpop.trf.xlu0 }
 0x142   :  { %2088 = verf.f32 %v403_v31  ;;  %v340_v36 = vadd.f32 %v2517_v33, %v233_v34 }
 0x144   :  { %v404_v13 = vmul.f32 0.70710677, %v340_v36  ;;  %v372_v0 = vmul.f32 0.5, %v340_v36 }
 0x145   :  { %v234_v37 = vpop.trf.xlu1  ;;  %v2531_v38 = vpop.trf.xlu0 }
 0x146   :  { %2090 = verf.f32 %v404_v13  ;;  %v341_v39 = vadd.f32 %v2517_v33, %v234_v37 }
 0x147   :  { %v2085_v40 = vpop.eup %2084 }
 0x148   :  { %v405_v41 = vmul.f32 0.70710677, %v341_v39  ;;  %v465_v45 = vadd.f32 1.0, %v2085_v40  ;;  %v373_v10 = vmul.f32 0.5, %v341_v39 }
 0x149   :  { %v235_v42 = vpop.trf.xlu1  ;;  %v2534_v43 = vpop.trf.xlu0 }
 0x14a   :  { %2092 = verf.f32 %v405_v41  ;;  %v342_v44 = vadd.f32 %v2517_v33, %v235_v42  ;;  %v497_v54 = vmul.f32 %v465_v45, %v369_v47 }
 0x14b   :  { %v2087_v46 = vpop.eup %2086 }
 0x14c   :  { %v406_v49 = vmul.f32 0.70710677, %v342_v44  ;;  %v466_v50 = vadd.f32 1.0, %v2087_v46  ;;  %v374_v14 = vmul.f32 0.5, %v342_v44 }
 0x14d   :  { %v236_v51 = vpop.trf.xlu1  ;;  %v2537_v52 = vpop.trf.xlu0 }
 0x14e   :  { %2094 = verf.f32 %v406_v49  ;;  %v343_v53 = vadd.f32 %v2517_v33, %v236_v51  ;;  %v498_v55 = vmul.f32 %v466_v50, %v370_v48 }
 0x14f   :  { %v2089_v19 = vpop.eup %2088 }
 0x150   :  { %v407_v56 = vmul.f32 0.70710677, %v343_v53  ;;  %v529_v57 = vpack.c.bf16 %v498_v55, %v497_v54  ;;  %v467_v59 = vadd.f32 1.0, %v2089_v19  ;;  %v375_v42 = vmul.f32 0.5, %v343_v53 }
 0x151   :  { %v237_v58 = vpop.trf.xlu1  ;;  %v2542_v62 = vpop.trf.xlu0  ;;  %v2561_v55 = vadd.f32 %v2517_v33, %v2519_v11 }
 0x152   :  { %2096 = verf.f32 %v407_v56  ;;  %v344_v60 = vadd.f32 %v2517_v33, %v237_v58  ;;  %1936 = vmatprep.mubr.msk.bf16.mxu0 %vm584_vm0, %v529_v57  ;;  %v499_v25 = vmul.f32 %v467_v59, %v371_v63  ;;  %v2566_v56 = vadd.f32 %v2517_v33, %v2522_v12 }
 0x153   :  { %v2091_v61 = vpop.eup %2090  ;;  %v2576_v12 = vadd.f32 %v2517_v33, %v2525_v24 }
 0x154   :  { %v468_v2 = vadd.f32 1.0, %v2091_v61  ;;  %v408_v3 = vmul.f32 0.70710677, %v344_v60  ;;  %v376_v44 = vmul.f32 0.5, %v344_v60  ;;  %v417_v61 = vmul.f32 0.70710677, %v2561_v55 }
 0x155   :  { %v238_v4 = vpop.trf.xlu1  ;;  %v2545_v7 = vpop.trf.xlu0 }
 0x156   :  { %v500_v27 = vmul.f32 %v468_v2, %v372_v0  ;;  %2098 = verf.f32 %v408_v3  ;;  %v345_v28 = vadd.f32 %v2517_v33, %v238_v4  ;;  %v418_v4 = vmul.f32 0.70710677, %v2566_v56 }
 0x157   :  { %v2093_v5 = vpop.eup %2092 }
 0x158   :  { %v530_v29 = vpack.c.bf16 %v500_v27, %v499_v25  ;;  %v409_v6 = vmul.f32 0.70710677, %v345_v28  ;;  %v469_v8 = vadd.f32 1.0, %v2093_v5  ;;  %v377_v11 = vmul.f32 0.5, %v345_v28 }
 0x159   :  { %v239_v32 = vpop.trf.xlu1  ;;  %v2550_v34 = vpop.trf.xlu0  ;;  %v2583_v28 = vadd.f32 %v2517_v33, %v2528_v35 }
 0x15a   :  { %2100 = verf.f32 %v409_v6  ;;  %v346_v9 = vadd.f32 %v2517_v33, %v239_v32  ;;  %1937 = vmatmul.mubr.msk.bf16.vlgmr.msra.gmra.mxu0 %vm584_vm0, %v530_v29  ;;  %v501_v21 = vmul.f32 %v469_v8, %v373_v10  ;;  %v2587_v32 = vadd.f32 %v2517_v33, %v2531_v38 }
 0x15b   :  { %v2095_v30 = vpop.eup %2094 }
 0x15c   :  { %v470_v15 = vadd.f32 1.0, %v2095_v30  ;;  %v410_v16 = vmul.f32 0.70710677, %v346_v9  ;;  %v378_v0 = vmul.f32 0.5, %v346_v9  ;;  %v419_v9 = vmul.f32 0.70710677, %v2576_v12 }
 0x15d   :  { %v240_v17 = vpop.trf.xlu1  ;;  %v2554_v48 = vpop.trf.xlu0  ;;  %v2593_v30 = vadd.f32 %v2517_v33, %v2534_v43 }
 0x15e   :  { %v502_v23 = vmul.f32 %v470_v15, %v374_v14  ;;  %2102 = verf.f32 %v410_v16  ;;  %v347_v26 = vadd.f32 %v2517_v33, %v240_v17  ;;  %v420_v16 = vmul.f32 0.70710677, %v2583_v28 }
 0x15f   :  { %v2097_v31 = vpop.eup %2096  ;;  %v421_v17 = vmul.f32 0.70710677, %v2587_v32 }
 0x160   :  { %v531_v36 = vpack.c.bf16 %v502_v23, %v501_v21  ;;  %v411_v13 = vmul.f32 0.70710677, %v347_v26  ;;  %v471_v40 = vadd.f32 1.0, %v2097_v31  ;;  %v379_v21 = vmul.f32 0.5, %v347_v26 }
 0x161   :  { %v241_v37 = vpop.trf.xlu1  ;;  %v2571_v63 = vpop.trf.xlu0 }
 0x162   :  { %2104 = verf.f32 %v411_v13  ;;  %v348_v41 = vadd.f32 %v2517_v33, %v241_v37  ;;  %1940 = vmatprep.mubr.msk.bf16.mxu0 %vm584_vm0, %v531_v36  ;;  %v503_v49 = vmul.f32 %v471_v40, %v375_v42  ;;  %v422_v36 = vmul.f32 0.70710677, %v2593_v30 }
 0x163   :  { %v2099_v39 = vpop.eup %2098  ;;  %v2605_v40 = vadd.f32 %v2517_v33, %v2537_v52  ;;  %v2609_v42 = vadd.f32 %v2517_v33, %v2542_v62 }
 0x164   :  { %v472_v45 = vadd.f32 1.0, %v2099_v39  ;;  %v412_v46 = vmul.f32 0.70710677, %v348_v41  ;;  %v380_v23 = vmul.f32 0.5, %v348_v41 }
 0x165   :  { %v242_v47 = vpop.trf.xlu1  ;;  %v326_v14 = vpop.trf.xlu0  ;;  %v424_v62 = vmul.f32 0.70710677, %v2609_v42 }
 0x166   :  { %v504_v50 = vmul.f32 %v472_v45, %v376_v44  ;;  %2106 = verf.f32 %v412_v46  ;;  %v2557_v51 = vadd.f32 %v2517_v33, %v242_v47  ;;  %v2613_v44 = vadd.f32 %v2517_v33, %v2545_v7 }
 0x167   :  { %v2101_v54 = vpop.eup %2100  ;;  %v2617_v45 = vadd.f32 %v2517_v33, %v2550_v34  ;;  %v423_v46 = vmul.f32 0.70710677, %v2605_v40  ;;  %v2627_v34 = vadd.f32 %v2517_v33, %v2554_v48  ;;  %v2639_v48 = vadd.f32 %v2517_v33, %v2571_v63 }
 0x168   :  { %v532_v19 = vpack.c.bf16 %v504_v50, %v503_v49  ;;  %v413_v53 = vmul.f32 0.70710677, %v2557_v51  ;;  %v473_v58 = vadd.f32 1.0, %v2101_v54  ;;  %v381_v49 = vmul.f32 0.5, %v2557_v51 }
 0x169   :  { %v243_v57 = vpop.trf.xlu1  ;;  %v327_v26 = vpop.trf.xlu0  ;;  %v425_v7 = vmul.f32 0.70710677, %v2613_v44 }
 0x16a   :  { %2108 = verf.f32 %v413_v53  ;;  %v350_v59 = vadd.f32 %v2517_v33, %v243_v57  ;;  %1941 = vmatmul.mubr.msk.bf16.gmra.mxu0 %vm584_vm0, %v532_v19  ;;  %v505_v27 = vmul.f32 %v473_v58, %v377_v11  ;;  %v426_v53 = vmul.f32 0.70710677, %v2617_v45 }
 0x16b   :  { %v2103_v60 = vpop.eup %2102  ;;  %v2630_v11 = vadd.f32 %v2517_v33, %v326_v14 }
 0x16c   :  { %v474_v2 = vadd.f32 1.0, %v2103_v60  ;;  %v414_v3 = vmul.f32 0.70710677, %v350_v59  ;;  %v382_v50 = vmul.f32 0.5, %v350_v59  ;;  %v385_v59 = vmul.f32 0.5, %v2561_v55 }
 0x16d   :  { %v244_v25 = vpop.trf.xlu1  ;;  %v328_v57 = vpop.trf.xlu0  ;;  %v429_v55 = vmul.f32 0.70710677, %v2630_v11 }
 0x16e   :  { %v506_v5 = vmul.f32 %v474_v2, %v378_v0  ;;  %2110 = verf.f32 %v414_v3  ;;  %v2579_v29 = vadd.f32 %v2517_v33, %v244_v25  ;;  %v2634_v0 = vadd.f32 %v2517_v33, %v327_v26 }
 0x16f   :  { %v2105_v6 = vpop.eup %2104  ;;  %2112 = verf.f32 %v417_v61  ;;  %v386_v2 = vmul.f32 0.5, %v2566_v56  ;;  %v387_v56 = vmul.f32 0.5, %v2576_v12 }
 0x170   :  { %v533_v8 = vpack.c.bf16 %v506_v5, %v505_v27  ;;  %v415_v24 = vmul.f32 0.70710677, %v2579_v29  ;;  %2114 = verf.f32 %v418_v4  ;;  %v475_v15 = vadd.f32 1.0, %v2105_v6 }
 0x171   :  { %v245_v10 = vpop.trf.xlu1  ;;  %v427_v27 = vmul.f32 0.70710677, %v2627_v34  ;;  %v383_v63 = vmul.f32 0.5, %v2579_v29  ;;  %v388_v29 = vmul.f32 0.5, %v2583_v28 }
 0x172   :  { %2116 = verf.f32 %v415_v24  ;;  %v2596_v35 = vadd.f32 %v2517_v33, %v245_v10  ;;  %1944 = vmatprep.mubr.msk.bf16.mxu0 %vm584_vm0, %v533_v8  ;;  %v507_v13 = vmul.f32 %v475_v15, %v379_v21  ;;  %v430_v24 = vmul.f32 0.70710677, %v2634_v0 }
 0x173   :  { %v2107_v38 = vpop.eup %2106  ;;  %2118 = verf.f32 %v419_v9  ;;  %v329_v9 = vpop.trf.xlu0 }
 0x174   :  { %v476_v31 = vadd.f32 1.0, %v2107_v38  ;;  %v416_v43 = vmul.f32 0.70710677, %v2596_v35  ;;  %v384_v14 = vmul.f32 0.5, %v2596_v35  ;;  %v428_v38 = vmul.f32 0.70710677, %v2639_v48 }
 0x175   :  { %v389_v35 = vmul.f32 0.5, %v2587_v32 }
 0x176   :  { %v508_v37 = vmul.f32 %v476_v31, %v380_v23  ;;  %2120 = verf.f32 %v416_v43  ;;  %v2650_v23 = vadd.f32 %v2517_v33, %v328_v57 }
 0x177   :  { %v2109_v39 = vpop.eup %2108  ;;  %2122 = verf.f32 %v420_v16 }
 0x178   :  { %v534_v41 = vpack.c.bf16 %v508_v37, %v507_v13  ;;  %2124 = verf.f32 %v421_v17  ;;  %v477_v52 = vadd.f32 1.0, %v2109_v39  ;;  %v390_v13 = vmul.f32 0.5, %v2593_v30 }
 0x179   :  { %2126 = verf.f32 %v422_v36  ;;  %v2653_v36 = vadd.f32 %v2517_v33, %v329_v9 }
 0x17a   :  { %1945 = vmatmul.mubr.msk.bf16.gmra.mxu0 %vm584_vm0, %v534_v41  ;;  %v509_v60 = vmul.f32 %v477_v52, %v381_v49  ;;  %2128 = verf.f32 %v423_v46 }
 0x17b   :  { %v2111_v47 = vpop.eup %2110  ;;  %2130 = verf.f32 %v424_v62  ;;  %v432_v33 = vmul.f32 0.70710677, %v2653_v36 }
 0x17c   :  { %v478_v54 = vadd.f32 1.0, %v2111_v47  ;;  %v2113_v19 = vpop.eup %2112  ;;  %2132 = verf.f32 %v425_v7  ;;  %v431_v47 = vmul.f32 0.70710677, %v2650_v23 }
 0x17d   :  { %v2115_v58 = vpop.eup %2114  ;;  %v481_v4 = vadd.f32 1.0, %v2113_v19  ;;  %2134 = verf.f32 %v426_v53  ;;  %v391_v19 = vmul.f32 0.5, %v2605_v40  ;;  %v392_v53 = vmul.f32 0.5, %v2609_v42 }
 0x17e   :  { %v510_v61 = vmul.f32 %v478_v54, %v382_v50  ;;  %v482_v25 = vadd.f32 1.0, %v2115_v58  ;;  %2136 = verf.f32 %v427_v27 }
 0x17f   :  { %v2117_v51 = vpop.eup %2116  ;;  %v513_v17 = vmul.f32 %v481_v4, %v385_v59  ;;  %2138 = verf.f32 %v429_v55 }
 0x180   :  { %v535_v3 = vpack.c.bf16 %v510_v61, %v509_v60  ;;  %v2119_v5 = vpop.eup %2118  ;;  %v479_v6 = vadd.f32 1.0, %v2117_v51  ;;  %v514_v21 = vmul.f32 %v482_v25, %v386_v2  ;;  %2140 = verf.f32 %v430_v24 }
 0x181   :  { %v483_v37 = vadd.f32 1.0, %v2119_v5  ;;  %2142 = verf.f32 %v428_v38  ;;  %v393_v61 = vmul.f32 0.5, %v2613_v44  ;;  %v394_v2 = vmul.f32 0.5, %v2617_v45 }
 0x182   :  { %1948 = vmatprep.mubr.msk.bf16.mxu0 %vm584_vm0, %v535_v3  ;;  %v511_v12 = vmul.f32 %v479_v6, %v383_v63  ;;  %v537_v41 = vpack.c.bf16 %v514_v21, %v513_v17  ;;  %2144 = verf.f32 %v431_v47  ;;  %v397_v44 = vmul.f32 0.5, %v2630_v11 }
 0x183   :  { %v2121_v8 = vpop.eup %2120  ;;  %v515_v32 = vmul.f32 %v483_v37, %v387_v56  ;;  %2146 = verf.f32 %v432_v33  ;;  %v398_v45 = vmul.f32 0.5, %v2634_v0  ;;  %v396_v63 = vmul.f32 0.5, %v2639_v48 }
 0x184   :  { %v2123_v10 = vpop.eup %2122  ;;  %v480_v15 = vadd.f32 1.0, %v2121_v8  ;;  %v395_v8 = vmul.f32 0.5, %v2627_v34 }
 0x185   :  { %v2125_v16 = vpop.eup %2124  ;;  %v484_v39 = vadd.f32 1.0, %v2123_v10 }
 0x186   :  { %v2127_v31 = vpop.eup %2126  ;;  %v512_v43 = vmul.f32 %v480_v15, %v384_v14  ;;  %v485_v52 = vadd.f32 1.0, %v2125_v16 }
 0x187   :  { %v486_v46 = vadd.f32 1.0, %v2127_v31  ;;  %v2129_v62 = vpop.eup %2128  ;;  %v516_v30 = vmul.f32 %v484_v39, %v388_v29  ;;  %v399_v31 = vmul.f32 0.5, %v2650_v23  ;;  %v2056_v39 = vld [vmem:[%s2962_s5 + $0x18] sm:$0xff]   ;;  %v2057_v23 = vld [vmem:[%s2962_s5 + $0x10] sm:$0xff]  }
 0x188   :  { %v536_v26 = vpack.c.bf16 %v512_v43, %v511_v12  ;;  %v2131_v28 = vpop.eup %2130  ;;  %v517_v50 = vmul.f32 %v485_v52, %v389_v35  ;;  %v487_v58 = vadd.f32 1.0, %v2129_v62  ;;  %v400_v12 = vmul.f32 0.5, %v2653_v36  ;;  %1968 = vmatprep.subr.bf16.mxu1 %v2056_v39  ;;  %v2058_v36 = vld [vmem:[%s2962_s5 + $0x8] sm:$0xff]   ;;  %v2062_v52 = vld [vmem:[#allocation2 + $0x74] ss:$8 sps:$4 sm:$0xff]  }
 0x189   :  { %v2133_v49 = vpop.eup %2132  ;;  %v518_v54 = vmul.f32 %v486_v46, %v390_v13  ;;  %v538_v57 = vpack.c.bf16 %v516_v30, %v515_v32  ;;  %v488_v60 = vadd.f32 1.0, %v2131_v28  ;;  %1969 = vmatpush3.bf16.msra.mxu1 %v2056_v39  ;;  %1490 = vmatprep.subr.bf16.mxu0 %v2062_v52  ;;  %v2695_v46 = vld [vmem:[%s2961_s4] ss:$0 sm:$0xff] }
 0x18a   :  { %1949 = vmatmul.mubr.msk.bf16.gmra.mxu0 %vm584_vm0, %v536_v26  ;;  %v2135_v7 = vpop.eup %2134  ;;  %v489_v59 = vadd.f32 1.0, %v2133_v49  ;;  %v519_v40 = vmul.f32 %v487_v58, %v391_v19  ;;  %1970 = vmatprep.subr.bf16.mxu1 %v2057_v23  ;;  %v2059_v26 = vld [vmem:[%s2962_s5] sm:$0xff]  }
 0x18b   :  { %1952 = vmatprep.mubr.msk.bf16.mxu0 %vm584_vm0, %v537_v41  ;;  %v539_v51 = vpack.c.bf16 %v518_v54, %v517_v50  ;;  %v490_v3 = vadd.f32 1.0, %v2135_v7  ;;  %v2137_v4 = vpop.eup %2136  ;;  %v520_v5 = vmul.f32 %v488_v60, %v392_v53  ;;  %v2060_v41 = vld [vmem:[#allocation2 + $0x70] ss:$8 sps:$4 sm:$0xff]  }
 0x18c   :  { %v2139_v25 = vpop.eup %2138  ;;  %v521_v6 = vmul.f32 %v489_v59, %v393_v61  ;;  %v491_v10 = vadd.f32 1.0, %v2137_v4  ;;  %1491 = vmatpush1.bf16.msra.mxu0 %v2060_v41 }
 0x18d   :  { %v2141_v27 = vpop.eup %2140  ;;  %v522_v55 = vmul.f32 %v490_v3, %v394_v2  ;;  %v493_v56 = vadd.f32 1.0, %v2139_v25  ;;  %v540_v9 = vpack.c.bf16 %v520_v5, %v519_v40  ;;  %1971 = vmatpush3.bf16.msra.mxu1 %v2057_v23 }
 0x18e   :  { %v2143_v42 = vpop.eup %2142  ;;  %v494_v24 = vadd.f32 1.0, %v2141_v27  ;;  %v523_v34 = vmul.f32 %v491_v10, %v395_v8  ;;  %1972 = vmatprep.subr.bf16.mxu1 %v2058_v36 }
 0x18f   :  { %v492_v14 = vadd.f32 1.0, %v2143_v42  ;;  %v541_v15 = vpack.c.bf16 %v522_v55, %v521_v6  ;;  %v2145_v38 = vpop.eup %2144  ;;  %v525_v17 = vmul.f32 %v493_v56, %v397_v44 }
 0x190   :  { %v2147_v16 = vpop.eup %2146  ;;  %v526_v21 = vmul.f32 %v494_v24, %v398_v45  ;;  %v495_v0 = vadd.f32 1.0, %v2145_v38 }
 0x191   :  { %v524_v11 = vmul.f32 %v492_v14, %v396_v63  ;;  %v496_v43 = vadd.f32 1.0, %v2147_v16  ;;  %1973 = vmatpush3.bf16.msra.mxu1 %v2058_v36 }
 0x192   :  { %1953 = vmatmul.mubr.msk.bf16.gmra.mxu0 %vm584_vm0, %v538_v57  ;;  %v543_v29 = vpack.c.bf16 %v526_v21, %v525_v17  ;;  %v527_v35 = vmul.f32 %v495_v0, %v399_v31  ;;  %1974 = vmatprep.subr.bf16.mxu1 %v2059_v26 }
 0x193   :  { %1956 = vmatprep.mubr.msk.bf16.mxu0 %vm584_vm0, %v539_v51  ;;  %v542_v48 = vpack.c.bf16 %v524_v11, %v523_v34  ;;  %v528_v13 = vmul.f32 %v496_v43, %v400_v12 }
 0x195   :  { %v544_v37 = vpack.c.bf16 %v528_v13, %v527_v35  ;;  %1975 = vmatpush3.bf16.msra.mxu1 %v2059_v26 }
 0x196   :  { %2008 = vmatprep.subr.bf16.mxu1 %v2062_v52 }
 0x19a   :  { %1957 = vmatmul.mubr.msk.bf16.gmra.mxu0 %vm584_vm0, %v540_v9 }
 0x19b   :  { %1960 = vmatprep.mubr.msk.bf16.mxu0 %vm584_vm0, %v541_v15 }
 0x1a2   :  { %1961 = vmatmul.mubr.msk.bf16.gmra.mxu0 %vm584_vm0, %v542_v48 }
 0x1a3   :  { %1964 = vmatprep.mubr.msk.bf16.mxu0 %vm584_vm0, %v543_v29 }
 0x1aa   :  { %1965 = vmatmul.mubr.msk.bf16.gmra.mxu0 %vm584_vm0, %v544_v37 }
 0x1ab   :  { %1522 = vmatprep.mubr.bf16.mxu0 %v2324_v1 }
 0x21a   :  { %v1938_v47 = vpop.f32.mrf.mxu0 }
 0x21b   :  { %v676_v33 = vadd.f32 %v1938_v47, %v2695_v46 }
 0x21c   :  { %v667_v62 = vpop.f32.mrf.mxu0 }
 0x21d   :  { %v668_v28 = vadd.f32 %v2695_v46, %v667_v62  ;;  %v828_v32 = vmul.f32 0.70710677, %v676_v33  ;;  %v796_v63 = vmul.f32 0.5, %v676_v33 }
 0x21e   :  { %v1939_v30 = vpop.f32.mrf.mxu0 }
 0x21f   :  { %v826_v49 = vmul.f32 0.70710677, %v668_v28  ;;  %v679_v50 = vadd.f32 %v1939_v30, %v2695_v46  ;;  %v794_v45 = vmul.f32 0.5, %v668_v28 }
 0x220   :  { %v670_v54 = vpop.f32.mrf.mxu0 }
 0x221   :  { %2148 = verf.f32 %v826_v49  ;;  %v829_v7 = vmul.f32 0.70710677, %v679_v50  ;;  %v671_v19 = vadd.f32 %v2695_v46, %v670_v54  ;;  %v797_v44 = vmul.f32 0.5, %v679_v50 }
 0x222   :  { %2150 = verf.f32 %v828_v32 }
 0x223   :  { %2152 = verf.f32 %v829_v7  ;;  %v827_v53 = vmul.f32 0.70710677, %v671_v19  ;;  %v795_v24 = vmul.f32 0.5, %v671_v19 }
 0x225   :  { %2154 = verf.f32 %v827_v53 }
 0x22a   :  { %v1942_v57 = vpop.f32.mrf.mxu0 }
 0x22b   :  { %v692_v58 = vadd.f32 %v1942_v57, %v2695_v46 }
 0x22c   :  { %v683_v60 = vpop.f32.mrf.mxu0 }
 0x22d   :  { %v684_v61 = vadd.f32 %v2695_v46, %v683_v60  ;;  %v832_v59 = vmul.f32 0.70710677, %v692_v58  ;;  %v800_v49 = vmul.f32 0.5, %v692_v58 }
 0x22e   :  { %v2149_v51 = vpop.eup %2148  ;;  %v1943_v2 = vpop.f32.mrf.mxu0 }
 0x22f   :  { %v2151_v3 = vpop.eup %2150  ;;  %v830_v4 = vmul.f32 0.70710677, %v684_v61  ;;  %v695_v27 = vadd.f32 %v1943_v2, %v2695_v46  ;;  %v890_v6 = vadd.f32 1.0, %v2149_v51  ;;  %v798_v62 = vmul.f32 0.5, %v684_v61 }
 0x230   :  { %v2153_v25 = vpop.eup %2152  ;;  %v686_v40 = vpop.f32.mrf.mxu0  ;;  %v892_v8 = vadd.f32 1.0, %v2151_v3 }
 0x231   :  { %v893_v5 = vadd.f32 1.0, %v2153_v25  ;;  %2156 = verf.f32 %v830_v4  ;;  %v687_v42 = vadd.f32 %v2695_v46, %v686_v40  ;;  %v833_v56 = vmul.f32 0.70710677, %v695_v27 }
 0x232   :  { %v2155_v55 = vpop.eup %2154  ;;  %2158 = verf.f32 %v832_v59  ;;  %v922_v15 = vmul.f32 %v890_v6, %v794_v45  ;;  %v924_v16 = vmul.f32 %v892_v8, %v796_v63  ;;  %v801_v36 = vmul.f32 0.5, %v695_v27 }
 0x233   :  { %v831_v9 = vmul.f32 0.70710677, %v687_v42  ;;  %v891_v10 = vadd.f32 1.0, %v2155_v55  ;;  %v925_v14 = vmul.f32 %v893_v5, %v797_v44  ;;  %2160 = verf.f32 %v833_v56 }
 0x234   :  { %v799_v28 = vmul.f32 0.5, %v687_v42 }
 0x235   :  { %2162 = verf.f32 %v831_v9  ;;  %v923_v38 = vmul.f32 %v891_v10, %v795_v24  ;;  %v955_v21 = vpack.c.bf16 %v925_v14, %v924_v16 }
 0x237   :  { %v954_v17 = vpack.c.bf16 %v923_v38, %v922_v15 }
 0x239   :  { %1976 = vmatprep.mubr.msk.bf16.mxu1 %vm584_vm0, %v954_v17 }
 0x23a   :  { %v1946_v34 = vpop.f32.mrf.mxu0  ;;  %1977 = vmatmul.mubr.msk.bf16.vlgmr.msra.gmra.mxu1 %vm584_vm0, %v955_v21 }
 0x23b   :  { %v2708_v11 = vadd.f32 %v1946_v34, %v2695_v46  ;;  %2016 = vmatpush1.bf16.msra.mxu1 %v2060_v41 }
 0x23c   :  { %v699_v31 = vpop.f32.mrf.mxu0 }
 0x23d   :  { %v836_v0 = vmul.f32 0.70710677, %v2708_v11  ;;  %v700_v12 = vadd.f32 %v2695_v46, %v699_v31  ;;  %v804_v38 = vmul.f32 0.5, %v2708_v11 }
 0x23e   :  { %v2157_v43 = vpop.eup %2156  ;;  %v1947_v29 = vpop.f32.mrf.mxu0 }
 0x23f   :  { %v2159_v48 = vpop.eup %2158  ;;  %v834_v35 = vmul.f32 0.70710677, %v700_v12  ;;  %v711_v13 = vadd.f32 %v1947_v29, %v2695_v46  ;;  %v894_v23 = vadd.f32 1.0, %v2157_v43  ;;  %2164 = verf.f32 %v836_v0 }
 0x240   :  { %v702_v37 = vpop.f32.mrf.mxu0  ;;  %v2161_v39 = vpop.eup %2160  ;;  %v896_v41 = vadd.f32 1.0, %v2159_v48  ;;  %v802_v27 = vmul.f32 0.5, %v700_v12 }
 0x241   :  { %v703_v26 = vadd.f32 %v2695_v46, %v702_v37  ;;  %v897_v47 = vadd.f32 1.0, %v2161_v39  ;;  %2166 = verf.f32 %v834_v35  ;;  %v837_v33 = vmul.f32 0.70710677, %v711_v13 }
 0x242   :  { %v2163_v52 = vpop.eup %2162  ;;  %v926_v54 = vmul.f32 %v894_v23, %v798_v62  ;;  %v928_v19 = vmul.f32 %v896_v41, %v800_v49  ;;  %v805_v55 = vmul.f32 0.5, %v711_v13 }
 0x243   :  { %v895_v32 = vadd.f32 1.0, %v2163_v52  ;;  %v835_v30 = vmul.f32 0.70710677, %v703_v26  ;;  %v929_v50 = vmul.f32 %v897_v47, %v801_v36  ;;  %2168 = verf.f32 %v837_v33 }
 0x244   :  { %v803_v10 = vmul.f32 0.5, %v703_v26 }
 0x245   :  { %v927_v7 = vmul.f32 %v895_v32, %v799_v28  ;;  %2170 = verf.f32 %v835_v30  ;;  %v957_v57 = vpack.c.bf16 %v929_v50, %v928_v19 }
 0x247   :  { %v956_v53 = vpack.c.bf16 %v927_v7, %v926_v54 }
 0x249   :  { %1980 = vmatprep.mubr.msk.bf16.mxu1 %vm584_vm0, %v956_v53 }
 0x24a   :  { %v1950_v60 = vpop.f32.mrf.mxu0  ;;  %1981 = vmatmul.mubr.msk.bf16.gmra.mxu1 %vm584_vm0, %v957_v57 }
 0x24b   :  { %v2717_v51 = vadd.f32 %v1950_v60, %v2695_v46 }
 0x24c   :  { %v715_v61 = vpop.f32.mrf.mxu0  ;;  %v2165_v58 = vpop.eup %2164 }
 0x24d   :  { %v716_v59 = vadd.f32 %v2695_v46, %v715_v61  ;;  %v840_v2 = vmul.f32 0.70710677, %v2717_v51  ;;  %v900_v56 = vadd.f32 1.0, %v2165_v58 }
 0x24e   :  { %v1951_v3 = vpop.f32.mrf.mxu0  ;;  %v2167_v4 = vpop.eup %2166 }
 0x24f   :  { %v838_v25 = vmul.f32 0.70710677, %v716_v59  ;;  %v727_v40 = vadd.f32 %v1951_v3, %v2695_v46  ;;  %v898_v6 = vadd.f32 1.0, %v2167_v4  ;;  %v932_v0 = vmul.f32 %v900_v56, %v804_v38 }
 0x250   :  { %v718_v5 = vpop.f32.mrf.mxu0  ;;  %v2169_v42 = vpop.eup %2168  ;;  %v806_v30 = vmul.f32 0.5, %v716_v59 }
 0x251   :  { %2172 = verf.f32 %v838_v25  ;;  %v719_v8 = vadd.f32 %v2695_v46, %v718_v5  ;;  %v901_v45 = vadd.f32 1.0, %v2169_v42  ;;  %v841_v24 = vmul.f32 0.70710677, %v727_v40 }
 0x252   :  { %v2171_v44 = vpop.eup %2170  ;;  %2174 = verf.f32 %v840_v2  ;;  %v1954_v9 = vpop.f32.mrf.mxu0  ;;  %v930_v21 = vmul.f32 %v898_v6, %v802_v27  ;;  %v809_v61 = vmul.f32 0.5, %v727_v40  ;;  %v808_v25 = vmul.f32 0.5, %v2717_v51 }
 0x253   :  { %v899_v63 = vadd.f32 1.0, %v2171_v44  ;;  %v839_v14 = vmul.f32 0.70710677, %v719_v8  ;;  %v2724_v15 = vadd.f32 %v1954_v9, %v2695_v46  ;;  %v933_v16 = vmul.f32 %v901_v45, %v805_v55 }
 0x254   :  { %2176 = verf.f32 %v841_v24  ;;  %v731_v17 = vpop.f32.mrf.mxu0  ;;  %v807_v3 = vmul.f32 0.5, %v719_v8 }
 0x255   :  { %v931_v34 = vmul.f32 %v899_v63, %v803_v10  ;;  %2178 = verf.f32 %v839_v14  ;;  %v844_v31 = vmul.f32 0.70710677, %v2724_v15  ;;  %v2729_v12 = vadd.f32 %v2695_v46, %v731_v17 }
 0x256   :  { %v1955_v43 = vpop.f32.mrf.mxu0  ;;  %v959_v35 = vpack.c.bf16 %v933_v16, %v932_v0 }
 0x257   :  { %v958_v29 = vpack.c.bf16 %v931_v34, %v930_v21  ;;  %v2732_v48 = vadd.f32 %v1955_v43, %v2695_v46  ;;  %v842_v11 = vmul.f32 0.70710677, %v2729_v12  ;;  %2180 = verf.f32 %v844_v31 }
 0x258   :  { %v734_v13 = vpop.f32.mrf.mxu0 }
 0x259   :  { %v845_v37 = vmul.f32 0.70710677, %v2732_v48  ;;  %v2737_v39 = vadd.f32 %v2695_v46, %v734_v13  ;;  %1984 = vmatprep.mubr.msk.bf16.mxu1 %vm584_vm0, %v958_v29  ;;  %2182 = verf.f32 %v842_v11  ;;  %v813_v0 = vmul.f32 0.5, %v2732_v48 }
 0x25a   :  { %v1958_v23 = vpop.f32.mrf.mxu0  ;;  %1985 = vmatmul.mubr.msk.bf16.gmra.mxu1 %vm584_vm0, %v959_v35  ;;  %v810_v35 = vmul.f32 0.5, %v2729_v12 }
 0x25b   :  { %2184 = verf.f32 %v845_v37  ;;  %v843_v36 = vmul.f32 0.70710677, %v2737_v39  ;;  %v2743_v26 = vadd.f32 %v1958_v23, %v2695_v46  ;;  %v811_v11 = vmul.f32 0.5, %v2737_v39 }
 0x25c   :  { %v747_v52 = vpop.f32.mrf.mxu0  ;;  %v812_v23 = vmul.f32 0.5, %v2724_v15 }
 0x25d   :  { %2186 = verf.f32 %v843_v36  ;;  %v848_v41 = vmul.f32 0.70710677, %v2743_v26  ;;  %v2747_v33 = vadd.f32 %v2695_v46, %v747_v52 }
 0x25e   :  { %v2173_v47 = vpop.eup %2172  ;;  %v1959_v62 = vpop.f32.mrf.mxu0 }
 0x25f   :  { %v2175_v28 = vpop.eup %2174  ;;  %v2750_v32 = vadd.f32 %v1959_v62, %v2695_v46  ;;  %v846_v49 = vmul.f32 0.70710677, %v2747_v33  ;;  %v902_v7 = vadd.f32 1.0, %v2173_v47  ;;  %2188 = verf.f32 %v848_v41 }
 0x260   :  { %v750_v50 = vpop.f32.mrf.mxu0  ;;  %v904_v60 = vadd.f32 1.0, %v2175_v28 }
 0x261   :  { %v2177_v54 = vpop.eup %2176  ;;  %v849_v19 = vmul.f32 0.70710677, %v2750_v32  ;;  %v2755_v53 = vadd.f32 %v2695_v46, %v750_v50  ;;  %2190 = verf.f32 %v846_v49  ;;  %v934_v6 = vmul.f32 %v902_v7, %v806_v30 }
 0x262   :  { %v2179_v57 = vpop.eup %2178  ;;  %v905_v58 = vadd.f32 1.0, %v2177_v54  ;;  %v1962_v2 = vpop.f32.mrf.mxu0  ;;  %v936_v56 = vmul.f32 %v904_v60, %v808_v25  ;;  %v814_v25 = vmul.f32 0.5, %v2747_v33 }
 0x263   :  { %v903_v4 = vadd.f32 1.0, %v2179_v57  ;;  %2192 = verf.f32 %v849_v19  ;;  %v847_v59 = vmul.f32 0.70710677, %v2755_v53  ;;  %v2760_v5 = vadd.f32 %v1962_v2, %v2695_v46 }
 0x264   :  { %v937_v27 = vmul.f32 %v905_v58, %v809_v61  ;;  %v763_v42 = vpop.f32.mrf.mxu0  ;;  %v2181_v44 = vpop.eup %2180 }
 0x265   :  { %v935_v55 = vmul.f32 %v903_v4, %v807_v3  ;;  %2194 = verf.f32 %v847_v59  ;;  %v2763_v40 = vadd.f32 %v2695_v46, %v763_v42  ;;  %v852_v8 = vmul.f32 0.70710677, %v2760_v5 }
 0x266   :  { %v1963_v45 = vpop.f32.mrf.mxu0  ;;  %v2183_v24 = vpop.eup %2182  ;;  %v961_v63 = vpack.c.bf16 %v937_v27, %v936_v56  ;;  %v908_v31 = vadd.f32 1.0, %v2181_v44  ;;  %v817_v59 = vmul.f32 0.5, %v2750_v32  ;;  %v815_v27 = vmul.f32 0.5, %v2755_v53 }
 0x267   :  { %v960_v9 = vpack.c.bf16 %v935_v55, %v934_v6  ;;  %v850_v51 = vmul.f32 0.70710677, %v2763_v40  ;;  %v2768_v14 = vadd.f32 %v1963_v45, %v2695_v46  ;;  %v906_v16 = vadd.f32 1.0, %v2183_v24 }
 0x268   :  { %v2185_v10 = vpop.eup %2184  ;;  %v766_v38 = vpop.f32.mrf.mxu0  ;;  %v940_v28 = vmul.f32 %v908_v31, %v812_v23  ;;  %v816_v6 = vmul.f32 0.5, %v2743_v26  ;;  %v818_v26 = vmul.f32 0.5, %v2763_v40 }
 0x269   :  { %v909_v17 = vadd.f32 1.0, %v2185_v10  ;;  %2196 = verf.f32 %v850_v51  ;;  %v2771_v21 = vadd.f32 %v2695_v46, %v766_v38  ;;  %1988 = vmatprep.mubr.msk.bf16.mxu1 %vm584_vm0, %v960_v9  ;;  %v853_v43 = vmul.f32 0.70710677, %v2768_v14 }
 0x26a   :  { %v2187_v34 = vpop.eup %2186  ;;  %2198 = verf.f32 %v852_v8  ;;  %v1966_v29 = vpop.f32.mrf.mxu0  ;;  %1989 = vmatmul.mubr.msk.bf16.gmra.mxu1 %vm584_vm0, %v961_v63  ;;  %v938_v41 = vmul.f32 %v906_v16, %v810_v35  ;;  %v821_v63 = vmul.f32 0.5, %v2768_v14  ;;  %v2063_v35 = vld [vmem:[#allocation2 + $0x60] ss:$8 sps:$4 sm:$0xff]  }
 0x26b   :  { %v907_v13 = vadd.f32 1.0, %v2187_v34  ;;  %v851_v37 = vmul.f32 0.70710677, %v2771_v21  ;;  %v941_v36 = vmul.f32 %v909_v17, %v813_v0  ;;  %2200 = verf.f32 %v853_v43  ;;  %v2065_v0 = vld [vmem:[#allocation2 + $0x64] ss:$8 sps:$4 sm:$0xff]  }
 0x26c   :  { %v2782_v52 = vadd.f32 %v1966_v29, %v2695_v46  ;;  %v779_v48 = vpop.f32.mrf.mxu0  ;;  %v2189_v62 = vpop.eup %2188  ;;  %v819_v16 = vmul.f32 0.5, %v2771_v21  ;;  %v820_v34 = vmul.f32 0.5, %v2760_v5  ;;  %1492 = vmatprep.subr.bf16.mxu0 %v2065_v0  ;;  %2009 = vmatprep.subr.bf16.mxu1 %v2065_v0  ;;  %v2066_v5 = vld [vmem:[#allocation2 + $0x50] ss:$8 sps:$4 sm:$0xff]  }
 0x26d   :  { %v939_v47 = vmul.f32 %v907_v13, %v811_v11  ;;  %2202 = verf.f32 %v851_v37  ;;  %v2786_v39 = vadd.f32 %v2695_v46, %v779_v48  ;;  %v963_v7 = vpack.c.bf16 %v941_v36, %v940_v28  ;;  %1493 = vmatpush1.bf16.msra.mxu0 %v2063_v35  ;;  %2017 = vmatpush1.bf16.msra.mxu1 %v2063_v35  ;;  %v2068_v36 = vld [vmem:[#allocation2 + $0x54] ss:$8 sps:$4 sm:$0xff]  }
 0x26e   :  { %v856_v12 = vmul.f32 0.70710677, %v2782_v52  ;;  %v1967_v30 = vpop.f32.mrf.mxu0  ;;  %v2191_v49 = vpop.eup %2190  ;;  %v912_v4 = vadd.f32 1.0, %v2189_v62  ;;  %1494 = vmatprep.subr.bf16.mxu0 %v2068_v36  ;;  %2010 = vmatprep.subr.bf16.mxu1 %v2068_v36 }
 0x26f   :  { %v962_v50 = vpack.c.bf16 %v939_v47, %v938_v41  ;;  %v2789_v15 = vadd.f32 %v1967_v30, %v2695_v46  ;;  %v910_v19 = vadd.f32 1.0, %v2191_v49  ;;  %v854_v57 = vmul.f32 0.70710677, %v2786_v39  ;;  %v2071_v49 = vld [vmem:[#allocation2 + $0x44] ss:$8 sps:$4 sm:$0xff]  }
 0x270   :  { %v2193_v54 = vpop.eup %2192  ;;  %v782_v60 = vpop.f32.mrf.mxu0  ;;  %2204 = verf.f32 %v856_v12  ;;  %v944_v45 = vmul.f32 %v912_v4, %v816_v6  ;;  %v822_v28 = vmul.f32 0.5, %v2786_v39  ;;  %v2075_v39 = vld [vmem:[#allocation2 + $0x20] ss:$8 sps:$4 sm:$0xff]   ;;  %v2078_v4 = vld [vmem:[#allocation2 + $0x10] ss:$8 sps:$4 sm:$0xff]  }
 0x271   :  { %v913_v61 = vadd.f32 1.0, %v2193_v54  ;;  %v857_v58 = vmul.f32 0.70710677, %v2789_v15  ;;  %v783_v2 = vadd.f32 %v2695_v46, %v782_v60  ;;  %1992 = vmatprep.mubr.msk.bf16.mxu1 %vm584_vm0, %v962_v50  ;;  %2206 = verf.f32 %v854_v57  ;;  %1495 = vmatpush1.bf16.msra.mxu0 %v2066_v5 }
 0x272   :  { %v2195_v3 = vpop.eup %2194  ;;  %1993 = vmatmul.mubr.msk.bf16.gmra.mxu1 %vm584_vm0, %v963_v7  ;;  %v942_v46 = vmul.f32 %v910_v19, %v814_v25  ;;  %v825_v62 = vmul.f32 0.5, %v2789_v15  ;;  %v824_v50 = vmul.f32 0.5, %v2782_v52  ;;  %v2069_v7 = vld [vmem:[#allocation2 + $0x40] ss:$8 sps:$4 sm:$0xff]   ;;  %1496 = vmatprep.subr.bf16.mxu0 %v2071_v49  ;;  %v2074_v15 = vld [vmem:[#allocation2 + $0x34] ss:$8 sps:$4 sm:$0xff]  }
 0x273   :  { %v911_v42 = vadd.f32 1.0, %v2195_v3  ;;  %2208 = verf.f32 %v857_v58  ;;  %v945_v55 = vmul.f32 %v913_v61, %v817_v59  ;;  %v855_v44 = vmul.f32 0.70710677, %v783_v2  ;;  %2018 = vmatpush1.bf16.msra.mxu1 %v2066_v5  ;;  %v2072_v3 = vld [vmem:[#allocation2 + $0x30] ss:$8 sps:$4 sm:$0xff]  }
 0x274   :  { %v823_v12 = vmul.f32 0.5, %v783_v2  ;;  %2011 = vmatprep.subr.bf16.mxu1 %v2071_v49  ;;  %v2077_v52 = vld [vmem:[#allocation2 + $0x24] ss:$8 sps:$4 sm:$0xff]   ;;  %v2080_v2 = vld [vmem:[#allocation2 + $0x14] ss:$8 sps:$4 sm:$0xff]  }
 0x275   :  { %v943_v56 = vmul.f32 %v911_v42, %v815_v27  ;;  %2210 = verf.f32 %v855_v44  ;;  %v965_v9 = vpack.c.bf16 %v945_v55, %v944_v45  ;;  %1497 = vmatpush1.bf16.msra.mxu0 %v2069_v7  ;;  %v2083_v59 = vld [vmem:[#allocation2 + $0x4] ss:$8 sps:$4 sm:$0xff]   ;;  %v2081_v25 = vld [vmem:[#allocation2] ss:$8 sps:$4 sm:$0xff]  }
 0x276   :  { %v2197_v8 = vpop.eup %2196  ;;  %1498 = vmatprep.subr.bf16.mxu0 %v2074_v15  ;;  %v2817_v42 = vld [vmem:[%s2963_s6] ss:$0 sm:$0xff] }
 0x277   :  { %v2199_v24 = vpop.eup %2198  ;;  %v964_v32 = vpack.c.bf16 %v943_v56, %v942_v46  ;;  %v914_v10 = vadd.f32 1.0, %v2197_v8  ;;  %2019 = vmatpush1.bf16.msra.mxu1 %v2069_v7 }
 0x278   :  { %v2201_v51 = vpop.eup %2200  ;;  %v916_v53 = vadd.f32 1.0, %v2199_v24  ;;  %2012 = vmatprep.subr.bf16.mxu1 %v2074_v15 }
 0x279   :  { %1996 = vmatprep.mubr.msk.bf16.mxu1 %vm584_vm0, %v964_v32  ;;  %v917_v38 = vadd.f32 1.0, %v2201_v51  ;;  %v946_v43 = vmul.f32 %v914_v10, %v818_v26  ;;  %1499 = vmatpush1.bf16.msra.mxu0 %v2072_v3 }
 0x27a   :  { %v2203_v33 = vpop.eup %2202  ;;  %1997 = vmatmul.mubr.msk.bf16.gmra.mxu1 %vm584_vm0, %v965_v9  ;;  %v948_v13 = vmul.f32 %v916_v53, %v820_v34  ;;  %1500 = vmatprep.subr.bf16.mxu0 %v2077_v52 }
 0x27b   :  { %v915_v17 = vadd.f32 1.0, %v2203_v33  ;;  %v949_v31 = vmul.f32 %v917_v38, %v821_v63  ;;  %2020 = vmatpush1.bf16.msra.mxu1 %v2072_v3 }
 0x27c   :  { %2013 = vmatprep.subr.bf16.mxu1 %v2077_v52 }
 0x27d   :  { %v947_v29 = vmul.f32 %v915_v17, %v819_v16  ;;  %v2205_v11 = vpop.eup %2204  ;;  %v967_v40 = vpack.c.bf16 %v949_v31, %v948_v13  ;;  %1501 = vmatpush1.bf16.msra.mxu0 %v2075_v39 }
 0x27e   :  { %v2207_v14 = vpop.eup %2206  ;;  %v920_v47 = vadd.f32 1.0, %v2205_v11  ;;  %1502 = vmatprep.subr.bf16.mxu0 %v2080_v2 }
 0x27f   :  { %v966_v37 = vpack.c.bf16 %v947_v29, %v946_v43  ;;  %v918_v48 = vadd.f32 1.0, %v2207_v14  ;;  %2021 = vmatpush1.bf16.msra.mxu1 %v2075_v39 }
 0x280   :  { %v2209_v23 = vpop.eup %2208  ;;  %v952_v60 = vmul.f32 %v920_v47, %v824_v50  ;;  %2014 = vmatprep.subr.bf16.mxu1 %v2080_v2 }
 0x281   :  { %v921_v21 = vadd.f32 1.0, %v2209_v23  ;;  %2000 = vmatprep.mubr.msk.bf16.mxu1 %vm584_vm0, %v966_v37  ;;  %v950_v19 = vmul.f32 %v918_v48, %v822_v28  ;;  %1503 = vmatpush1.bf16.msra.mxu0 %v2078_v4 }
 0x282   :  { %2001 = vmatmul.mubr.msk.bf16.gmra.mxu1 %vm584_vm0, %v967_v40  ;;  %v2211_v41 = vpop.eup %2210  ;;  %1504 = vmatprep.subr.bf16.mxu0 %v2083_v59 }
 0x283   :  { %v919_v30 = vadd.f32 1.0, %v2211_v41  ;;  %v953_v54 = vmul.f32 %v921_v21, %v825_v62  ;;  %2022 = vmatpush1.bf16.msra.mxu1 %v2078_v4 }
 0x284   :  { %2015 = vmatprep.subr.bf16.mxu1 %v2083_v59 }
 0x285   :  { %v951_v57 = vmul.f32 %v919_v30, %v823_v12  ;;  %v969_v58 = vpack.c.bf16 %v953_v54, %v952_v60  ;;  %1505 = vmatpush1.bf16.msra.mxu0 %v2081_v25 }
 0x287   :  { %v968_v61 = vpack.c.bf16 %v951_v57, %v950_v19  ;;  %2023 = vmatpush1.bf16.msra.mxu1 %v2081_v25 }
 0x289   :  { %2004 = vmatprep.mubr.msk.bf16.mxu1 %vm584_vm0, %v968_v61 }
 0x28a   :  { %2005 = vmatmul.mubr.msk.bf16.gmra.mxu1 %vm584_vm0, %v969_v58 }
 0x28b   :  { %1602 = vmatprep.mubr.bf16.mxu1 %v2324_v1 }
 0x2fa   :  { %v1978_v27 = vpop.f32.mrf.mxu1 }
 0x2fb   :  { %v1100_v45 = vadd.f32 %v1978_v27, %v2817_v42 }
 0x2fc   :  { %v1091_v6 = vpop.f32.mrf.mxu1 }
 0x2fd   :  { %v1092_v55 = vadd.f32 %v2817_v42, %v1091_v6  ;;  %v1252_v51 = vmul.f32 0.70710677, %v1100_v45  ;;  %v1220_v28 = vmul.f32 0.5, %v1100_v45 }
 0x2fe   :  { %v1979_v44 = vpop.f32.mrf.mxu1 }
 0x2ff   :  { %v1250_v46 = vmul.f32 0.70710677, %v1092_v55  ;;  %v1103_v56 = vadd.f32 %v1979_v44, %v2817_v42  ;;  %v1218_v29 = vmul.f32 0.5, %v1092_v55 }
 0x300   :  { %v1094_v8 = vpop.f32.mrf.mxu1 }
 0x301   :  { %2212 = verf.f32 %v1250_v46  ;;  %v1095_v24 = vadd.f32 %v2817_v42, %v1094_v8  ;;  %v1253_v32 = vmul.f32 0.70710677, %v1103_v56  ;;  %v1221_v47 = vmul.f32 0.5, %v1103_v56 }
 0x303   :  { %v1251_v9 = vmul.f32 0.70710677, %v1095_v24  ;;  %v1219_v35 = vmul.f32 0.5, %v1095_v24 }
 0x305   :  { %2214 = verf.f32 %v1251_v9 }
 0x306   :  { %2216 = verf.f32 %v1253_v32 }
 0x307   :  { %2218 = verf.f32 %v1252_v51 }
 0x30a   :  { %v1982_v10 = vpop.f32.mrf.mxu1 }
 0x30b   :  { %v1116_v31 = vadd.f32 %v1982_v10, %v2817_v42 }
 0x30c   :  { %v1107_v33 = vpop.f32.mrf.mxu1 }
 0x30d   :  { %v1108_v53 = vadd.f32 %v2817_v42, %v1107_v33  ;;  %v1256_v36 = vmul.f32 0.70710677, %v1116_v31  ;;  %v1224_v9 = vmul.f32 0.5, %v1116_v31 }
 0x30e   :  { %v2213_v63 = vpop.eup %2212  ;;  %v1983_v38 = vpop.f32.mrf.mxu1 }
 0x30f   :  { %v1254_v26 = vmul.f32 0.70710677, %v1108_v53  ;;  %v1119_v16 = vadd.f32 %v1983_v38, %v2817_v42  ;;  %v1314_v34 = vadd.f32 1.0, %v2213_v63  ;;  %v1222_v39 = vmul.f32 0.5, %v1108_v53 }
 0x310   :  { %v1110_v17 = vpop.f32.mrf.mxu1 }
 0x311   :  { %v1111_v0 = vadd.f32 %v2817_v42, %v1110_v17  ;;  %2220 = verf.f32 %v1254_v26  ;;  %v1257_v13 = vmul.f32 0.70710677, %v1119_v16  ;;  %v1346_v23 = vmul.f32 %v1314_v34, %v1218_v29 }
 0x312   :  { %v2215_v43 = vpop.eup %2214  ;;  %v1225_v24 = vmul.f32 0.5, %v1119_v16 }
 0x313   :  { %v1315_v11 = vadd.f32 1.0, %v2215_v43  ;;  %v1255_v14 = vmul.f32 0.70710677, %v1111_v0  ;;  %v2217_v37 = vpop.eup %2216  ;;  %v1223_v2 = vmul.f32 0.5, %v1111_v0 }
 0x314   :  { %v2219_v21 = vpop.eup %2218  ;;  %v1317_v5 = vadd.f32 1.0, %v2217_v37 }
 0x315   :  { %v1347_v40 = vmul.f32 %v1315_v11, %v1219_v35  ;;  %2222 = verf.f32 %v1255_v14  ;;  %v1316_v41 = vadd.f32 1.0, %v2219_v21 }
 0x316   :  { %2224 = verf.f32 %v1257_v13  ;;  %v1349_v12 = vmul.f32 %v1317_v5, %v1221_v47 }
 0x317   :  { %v1378_v48 = vpack.c.bf16 %v1347_v40, %v1346_v23  ;;  %2226 = verf.f32 %v1256_v36  ;;  %v1348_v49 = vmul.f32 %v1316_v41, %v1220_v28 }
 0x319   :  { %1523 = vmatmul.mubr.bf16.vlgmr.msra.gmra.mxu0 %v1378_v48  ;;  %v1379_v57 = vpack.c.bf16 %v1349_v12, %v1348_v49 }
 0x31a   :  { %v1986_v62 = vpop.f32.mrf.mxu1  ;;  %1532 = vmatprep.mubr.bf16.mxu0 %v2324_v1 }
 0x31b   :  { %v2833_v58 = vadd.f32 %v1986_v62, %v2817_v42 }
 0x31c   :  { %v1123_v30 = vpop.f32.mrf.mxu1 }
 0x31d   :  { %v1124_v50 = vadd.f32 %v2817_v42, %v1123_v30  ;;  %v1260_v44 = vmul.f32 0.70710677, %v2833_v58 }
 0x31e   :  { %v1987_v54 = vpop.f32.mrf.mxu1  ;;  %v2221_v7 = vpop.eup %2220 }
 0x31f   :  { %v1258_v19 = vmul.f32 0.70710677, %v1124_v50  ;;  %v2830_v60 = vadd.f32 %v1987_v54, %v2817_v42  ;;  %v1318_v15 = vadd.f32 1.0, %v2221_v7  ;;  %v1226_v11 = vmul.f32 0.5, %v1124_v50 }
 0x320   :  { %v1126_v61 = vpop.f32.mrf.mxu1 }
 0x321   :  { %2228 = verf.f32 %v1258_v19  ;;  %v1127_v3 = vadd.f32 %v2817_v42, %v1126_v61  ;;  %1533 = vmatmul.mubr.bf16.gmra.mxu0 %v1379_v57  ;;  %v1261_v59 = vmul.f32 0.70710677, %v2830_v60  ;;  %v1350_v6 = vmul.f32 %v1318_v15, %v1222_v39 }
 0x322   :  { %v2223_v52 = vpop.eup %2222  ;;  %1542 = vmatprep.mubr.bf16.mxu0 %v2324_v1  ;;  %v1229_v49 = vmul.f32 0.5, %v2830_v60  ;;  %v1228_v15 = vmul.f32 0.5, %v2833_v58 }
 0x323   :  { %v1319_v4 = vadd.f32 1.0, %v2223_v52  ;;  %v1259_v25 = vmul.f32 0.70710677, %v1127_v3  ;;  %v2225_v27 = vpop.eup %2224  ;;  %v1227_v13 = vmul.f32 0.5, %v1127_v3 }
 0x324   :  { %v2227_v46 = vpop.eup %2226  ;;  %v1321_v56 = vadd.f32 1.0, %v2225_v27 }
 0x325   :  { %v1351_v55 = vmul.f32 %v1319_v4, %v1223_v2  ;;  %2230 = verf.f32 %v1259_v25  ;;  %v1320_v45 = vadd.f32 1.0, %v2227_v46 }
 0x326   :  { %2232 = verf.f32 %v1261_v59  ;;  %v1353_v51 = vmul.f32 %v1321_v56, %v1225_v24 }
 0x327   :  { %v1380_v8 = vpack.c.bf16 %v1351_v55, %v1350_v6  ;;  %2234 = verf.f32 %v1260_v44  ;;  %v1352_v33 = vmul.f32 %v1320_v45, %v1224_v9 }
 0x329   :  { %1543 = vmatmul.mubr.bf16.gmra.mxu0 %v1380_v8  ;;  %v1381_v26 = vpack.c.bf16 %v1353_v51, %v1352_v33 }
 0x32a   :  { %v1990_v32 = vpop.f32.mrf.mxu1  ;;  %1552 = vmatprep.mubr.bf16.mxu0 %v2324_v1 }
 0x32b   :  { %v2848_v43 = vadd.f32 %v1990_v32, %v2817_v42 }
 0x32c   :  { %v1139_v10 = vpop.f32.mrf.mxu1 }
 0x32d   :  { %v2841_v53 = vadd.f32 %v2817_v42, %v1139_v10  ;;  %v1264_v48 = vmul.f32 0.70710677, %v2848_v43 }
 0x32e   :  { %v2229_v63 = vpop.eup %2228  ;;  %v1991_v38 = vpop.f32.mrf.mxu1 }
 0x32f   :  { %v1262_v17 = vmul.f32 0.70710677, %v2841_v53  ;;  %v2845_v34 = vadd.f32 %v1991_v38, %v2817_v42  ;;  %v1322_v0 = vadd.f32 1.0, %v2229_v63  ;;  %v1230_v32 = vmul.f32 0.5, %v2841_v53 }
 0x330   :  { %v1142_v16 = vpop.f32.mrf.mxu1 }
 0x331   :  { %v1143_v31 = vadd.f32 %v2817_v42, %v1142_v16  ;;  %1553 = vmatmul.mubr.bf16.gmra.mxu0 %v1381_v26  ;;  %2236 = verf.f32 %v1262_v17  ;;  %v1265_v40 = vmul.f32 0.70710677, %v2845_v34  ;;  %v1354_v21 = vmul.f32 %v1322_v0, %v1226_v11 }
 0x332   :  { %v2231_v29 = vpop.eup %2230  ;;  %v1994_v35 = vpop.f32.mrf.mxu1  ;;  %1562 = vmatprep.mubr.bf16.mxu0 %v2324_v1 }
 0x333   :  { %v1323_v14 = vadd.f32 1.0, %v2231_v29  ;;  %v1263_v37 = vmul.f32 0.70710677, %v1143_v31  ;;  %v2233_v23 = vpop.eup %2232  ;;  %v2860_v19 = vadd.f32 %v1994_v35, %v2817_v42  ;;  %v1231_v8 = vmul.f32 0.5, %v1143_v31 }
 0x334   :  { %v1155_v36 = vpop.f32.mrf.mxu1  ;;  %v2235_v41 = vpop.eup %2234  ;;  %v1325_v28 = vadd.f32 1.0, %v2233_v23 }
 0x335   :  { %v1355_v5 = vmul.f32 %v1323_v14, %v1227_v13  ;;  %2238 = verf.f32 %v1263_v37  ;;  %v1156_v47 = vadd.f32 %v2817_v42, %v1155_v36  ;;  %v1324_v7 = vadd.f32 1.0, %v2235_v41 }
 0x336   :  { %v1995_v62 = vpop.f32.mrf.mxu1  ;;  %2240 = verf.f32 %v1265_v40  ;;  %v1357_v3 = vmul.f32 %v1325_v28, %v1229_v49  ;;  %v1268_v4 = vmul.f32 0.70710677, %v2860_v19  ;;  %v1233_v13 = vmul.f32 0.5, %v2845_v34 }
 0x337   :  { %v2856_v12 = vadd.f32 %v1995_v62, %v2817_v42  ;;  %v1382_v30 = vpack.c.bf16 %v1355_v5, %v1354_v21  ;;  %v1266_v50 = vmul.f32 0.70710677, %v1156_v47  ;;  %2242 = verf.f32 %v1264_v48 }
 0x338   :  { %v1158_v54 = vpop.f32.mrf.mxu1  ;;  %v1356_v2 = vmul.f32 %v1324_v7, %v1228_v15  ;;  %v1234_v14 = vmul.f32 0.5, %v1156_v47  ;;  %v1232_v21 = vmul.f32 0.5, %v2848_v43  ;;  %v1236_v15 = vmul.f32 0.5, %v2860_v19 }
 0x339   :  { %v1159_v57 = vadd.f32 %v2817_v42, %v1158_v54  ;;  %1563 = vmatmul.mubr.bf16.gmra.mxu0 %v1382_v30  ;;  %2244 = verf.f32 %v1266_v50  ;;  %v1269_v60 = vmul.f32 0.70710677, %v2856_v12 }
 0x33a   :  { %v1998_v61 = vpop.f32.mrf.mxu1  ;;  %1572 = vmatprep.mubr.bf16.mxu0 %v2324_v1  ;;  %v1383_v27 = vpack.c.bf16 %v1357_v3, %v1356_v2 }
 0x33b   :  { %v1267_v52 = vmul.f32 0.70710677, %v1159_v57  ;;  %v2883_v35 = vadd.f32 %v1998_v61, %v2817_v42  ;;  %v1235_v37 = vmul.f32 0.5, %v1159_v57  ;;  %v1237_v61 = vmul.f32 0.5, %v2856_v12 }
 0x33c   :  { %v1171_v39 = vpop.f32.mrf.mxu1 }
 0x33d   :  { %2246 = verf.f32 %v1267_v52  ;;  %v2868_v55 = vadd.f32 %v2817_v42, %v1171_v39  ;;  %v1272_v28 = vmul.f32 0.70710677, %v2883_v35 }
 0x33e   :  { %v1999_v59 = vpop.f32.mrf.mxu1  ;;  %v2237_v25 = vpop.eup %2236  ;;  %2248 = verf.f32 %v1269_v60 }
 0x33f   :  { %2250 = verf.f32 %v1268_v4  ;;  %v1326_v46 = vadd.f32 1.0, %v2237_v25  ;;  %v1270_v33 = vmul.f32 0.70710677, %v2868_v55  ;;  %v2880_v17 = vadd.f32 %v1999_v59, %v2817_v42 }
 0x340   :  { %v1174_v6 = vpop.f32.mrf.mxu1  ;;  %v1238_v19 = vmul.f32 0.5, %v2868_v55  ;;  %v1240_v55 = vmul.f32 0.5, %v2883_v35 }
 0x341   :  { %v2871_v58 = vadd.f32 %v2817_v42, %v1174_v6  ;;  %1573 = vmatmul.mubr.bf16.gmra.mxu0 %v1383_v27  ;;  %v1358_v38 = vmul.f32 %v1326_v46, %v1230_v32  ;;  %v1273_v40 = vmul.f32 0.70710677, %v2880_v17 }
 0x342   :  { %v2239_v44 = vpop.eup %2238  ;;  %v2873_v56 = vpop.f32.mrf.mxu1  ;;  %1582 = vmatprep.mubr.bf16.mxu0 %v2324_v1 }
 0x343   :  { %v1327_v45 = vadd.f32 1.0, %v2239_v44  ;;  %v1271_v24 = vmul.f32 0.70710677, %v2871_v58  ;;  %v2241_v51 = vpop.eup %2240  ;;  %v1239_v46 = vmul.f32 0.5, %v2871_v58 }
 0x344   :  { %v1187_v9 = vpop.f32.mrf.mxu1  ;;  %v2243_v63 = vpop.eup %2242  ;;  %v1329_v16 = vadd.f32 1.0, %v2241_v51 }
 0x345   :  { %v1359_v10 = vmul.f32 %v1327_v45, %v1231_v8  ;;  %2252 = verf.f32 %v1271_v24  ;;  %v1328_v11 = vadd.f32 1.0, %v2243_v63  ;;  %v1188_v43 = vadd.f32 %v2817_v42, %v1187_v9 }
 0x346   :  { %v2245_v26 = vpop.eup %2244  ;;  %v2003_v0 = vpop.f32.mrf.mxu1  ;;  %2254 = verf.f32 %v1270_v33  ;;  %v1361_v5 = vmul.f32 %v1329_v16, %v1233_v13  ;;  %v1196_v8 = vadd.f32 %v2873_v56, %v2817_v42  ;;  %v1241_v56 = vmul.f32 0.5, %v2880_v17 }
 0x347   :  { %v1384_v31 = vpack.c.bf16 %v1359_v10, %v1358_v38  ;;  %v1330_v29 = vadd.f32 1.0, %v2245_v26  ;;  %v1360_v49 = vmul.f32 %v1328_v11, %v1232_v21  ;;  %2256 = verf.f32 %v1273_v40 }
 0x348   :  { %v1190_v48 = vpop.f32.mrf.mxu1  ;;  %2258 = verf.f32 %v1272_v28  ;;  %v1274_v4 = vmul.f32 0.70710677, %v1188_v43  ;;  %v1199_v27 = vadd.f32 %v2003_v0, %v2817_v42  ;;  %v1276_v10 = vmul.f32 0.70710677, %v1196_v8 }
 0x349   :  { %1583 = vmatmul.mubr.bf16.gmra.mxu0 %v1384_v31  ;;  %v1362_v41 = vmul.f32 %v1330_v29, %v1234_v14  ;;  %v1191_v47 = vadd.f32 %v2817_v42, %v1190_v48  ;;  %v1385_v7 = vpack.c.bf16 %v1361_v5, %v1360_v49  ;;  %v1242_v35 = vmul.f32 0.5, %v1188_v43 }
 0x34a   :  { %v2247_v53 = vpop.eup %2246  ;;  %1592 = vmatprep.mubr.bf16.mxu0 %v2324_v1  ;;  %v2006_v54 = vpop.f32.mrf.mxu1  ;;  %v1277_v24 = vmul.f32 0.70710677, %v1199_v27 }
 0x34b   :  { %v1331_v23 = vadd.f32 1.0, %v2247_v53  ;;  %v2249_v36 = vpop.eup %2248  ;;  %v1275_v60 = vmul.f32 0.70710677, %v1191_v47  ;;  %v1243_v40 = vmul.f32 0.5, %v1191_v47 }
 0x34c   :  { %v2251_v30 = vpop.eup %2250  ;;  %v1333_v34 = vadd.f32 1.0, %v2249_v36  ;;  %v1203_v39 = vpop.f32.mrf.mxu1  ;;  %v1212_v36 = vadd.f32 %v2006_v54, %v2817_v42 }
 0x34d   :  { %v1363_v62 = vmul.f32 %v1331_v23, %v1235_v37  ;;  %v1332_v57 = vadd.f32 1.0, %v2251_v30  ;;  %2260 = verf.f32 %v1275_v60  ;;  %v1204_v16 = vadd.f32 %v2817_v42, %v1203_v39 }
 0x34e   :  { %v1365_v3 = vmul.f32 %v1333_v34, %v1237_v61  ;;  %v2007_v6 = vpop.f32.mrf.mxu1  ;;  %2262 = verf.f32 %v1274_v4 }
 0x34f   :  { %v1386_v50 = vpack.c.bf16 %v1363_v62, %v1362_v41  ;;  %v1364_v2 = vmul.f32 %v1332_v57, %v1236_v15  ;;  %2264 = verf.f32 %v1277_v24  ;;  %v1278_v11 = vmul.f32 0.70710677, %v1204_v16 }
 0x350   :  { %v1206_v9 = vpop.f32.mrf.mxu1  ;;  %2266 = verf.f32 %v1276_v10  ;;  %v1215_v37 = vadd.f32 %v2007_v6, %v2817_v42  ;;  %v1280_v62 = vmul.f32 0.70710677, %v1212_v36  ;;  %v1246_v60 = vmul.f32 0.5, %v1204_v16 }
 0x351   :  { %1603 = vmatmul.mubr.bf16.vlgmr.msra.gmra.mxu1 %v1386_v50  ;;  %1593 = vmatmul.mubr.bf16.gmra.mxu0 %v1385_v7  ;;  %v1387_v12 = vpack.c.bf16 %v1365_v3, %v1364_v2  ;;  %v1207_v58 = vadd.f32 %v2817_v42, %v1206_v9  ;;  %v1245_v50 = vmul.f32 0.5, %v1199_v27  ;;  %v1244_v42 = vmul.f32 0.5, %v1196_v8 }
 0x352   :  { %1612 = vmatprep.mubr.bf16.mxu1 %v2324_v1  ;;  %v2253_v52 = vpop.eup %2252  ;;  %v1281_v5 = vmul.f32 0.70710677, %v1215_v37  ;;  %v1248_v6 = vmul.f32 0.5, %v1212_v36  ;;  %v2326_v9 = vmov -inf  }
 0x353   :  { %v2255_v59 = vpop.eup %2254  ;;  %v1335_v25 = vadd.f32 1.0, %v2253_v52  ;;  %v1279_v31 = vmul.f32 0.70710677, %v1207_v58  ;;  %v1247_v3 = vmul.f32 0.5, %v1207_v58  ;;  %1774 = vst [vmem:[#allocation5] sm:$0xf] %v2326_v9 }
 0x354   :  { %v1334_v44 = vadd.f32 1.0, %v2255_v59  ;;  %v2257_v32 = vpop.eup %2256 }
 0x355   :  { %v1367_v45 = vmul.f32 %v1335_v25, %v1239_v46  ;;  %v2259_v33 = vpop.eup %2258  ;;  %v1337_v63 = vadd.f32 1.0, %v2257_v32  ;;  %2268 = verf.f32 %v1279_v31 }
 0x356   :  { %v1366_v51 = vmul.f32 %v1334_v44, %v1238_v19  ;;  %v1336_v26 = vadd.f32 1.0, %v2259_v33  ;;  %2270 = verf.f32 %v1278_v11 }
 0x357   :  { %v1369_v0 = vmul.f32 %v1337_v63, %v1241_v56  ;;  %2272 = verf.f32 %v1281_v5 }
 0x358   :  { %v1388_v38 = vpack.c.bf16 %v1367_v45, %v1366_v51  ;;  %v1368_v53 = vmul.f32 %v1336_v26, %v1240_v55  ;;  %2274 = verf.f32 %v1280_v62 }
 0x359   :  { %1613 = vmatmul.mubr.bf16.gmra.mxu1 %v1387_v12  ;;  %v1249_v12 = vmul.f32 0.5, %v1215_v37 }
 0x35a   :  { %1622 = vmatprep.mubr.bf16.mxu1 %v2324_v1  ;;  %v2261_v29 = vpop.eup %2260  ;;  %v1389_v23 = vpack.c.bf16 %v1369_v0, %v1368_v53 }
 0x35b   :  { %v2263_v13 = vpop.eup %2262  ;;  %v1339_v14 = vadd.f32 1.0, %v2261_v29 }
 0x35c   :  { %v1338_v17 = vadd.f32 1.0, %v2263_v13  ;;  %v2265_v48 = vpop.eup %2264 }
 0x35d   :  { %v1371_v21 = vmul.f32 %v1339_v14, %v1243_v40  ;;  %v2267_v28 = vpop.eup %2266  ;;  %v1341_v30 = vadd.f32 1.0, %v2265_v48 }
 0x35e   :  { %v1370_v41 = vmul.f32 %v1338_v17, %v1242_v35  ;;  %v1340_v34 = vadd.f32 1.0, %v2267_v28 }
 0x35f   :  { %v1373_v47 = vmul.f32 %v1341_v30, %v1245_v50 }
 0x360   :  { %v1390_v49 = vpack.c.bf16 %v1371_v21, %v1370_v41  ;;  %v1372_v7 = vmul.f32 %v1340_v34, %v1244_v42 }
 0x361   :  { %1623 = vmatmul.mubr.bf16.gmra.mxu1 %v1388_v38 }
 0x362   :  { %1632 = vmatprep.mubr.bf16.mxu1 %v2324_v1  ;;  %v2269_v54 = vpop.eup %2268  ;;  %v1391_v43 = vpack.c.bf16 %v1373_v47, %v1372_v7 }
 0x363   :  { %v2271_v57 = vpop.eup %2270  ;;  %v1343_v61 = vadd.f32 1.0, %v2269_v54 }
 0x364   :  { %v1342_v15 = vadd.f32 1.0, %v2271_v57  ;;  %v2273_v39 = vpop.eup %2272 }
 0x365   :  { %v1375_v52 = vmul.f32 %v1343_v61, %v1247_v3  ;;  %v2275_v4 = vpop.eup %2274  ;;  %v1345_v59 = vadd.f32 1.0, %v2273_v39 }
 0x366   :  { %v1374_v2 = vmul.f32 %v1342_v15, %v1246_v60  ;;  %v1344_v27 = vadd.f32 1.0, %v2275_v4 }
 0x367   :  { %v1377_v44 = vmul.f32 %v1345_v59, %v1249_v12 }
 0x368   :  { %v1392_v25 = vpack.c.bf16 %v1375_v52, %v1374_v2  ;;  %v1376_v46 = vmul.f32 %v1344_v27, %v1248_v6 }
 0x369   :  { %1633 = vmatmul.mubr.bf16.gmra.mxu1 %v1389_v23 }
 0x36a   :  { %1642 = vmatprep.mubr.bf16.mxu1 %v2324_v1  ;;  %v1393_v8 = vpack.c.bf16 %v1377_v44, %v1376_v46 }
 0x371   :  { %1643 = vmatmul.mubr.bf16.gmra.mxu1 %v1390_v49 }
 0x372   :  { %1652 = vmatprep.mubr.bf16.mxu1 %v2324_v1 }
 0x379   :  { %1653 = vmatmul.mubr.bf16.gmra.mxu1 %v1391_v43 }
 0x37a   :  { %1662 = vmatprep.mubr.bf16.mxu1 %v2324_v1 }
 0x381   :  { %1663 = vmatmul.mubr.bf16.gmra.mxu1 %v1392_v25 }
 0x382   :  { %1672 = vmatprep.mubr.bf16.mxu1 %v2324_v1 }
 0x389   :  { %1673 = vmatmul.mubr.bf16.gmra.mxu1 %v1393_v8 }
 0x3d9   :  { %v1524_v19 = vpop.f32.mrf.mxu0 }
 0x3db   :  { %v1526_v45 = vpop.f32.mrf.mxu0 }
 0x3dd   :  { %v1528_v24 = vpop.f32.mrf.mxu0 }
 0x3df   :  { %v1530_v32 = vpop.f32.mrf.mxu0 }
 0x3e1   :  { %v1534_v51 = vpop.f32.mrf.mxu0 }
 0x3e2   :  { %v1683_v4 = vmax.f32 %v1524_v19, %v1534_v51 }
 0x3e3   :  { %v1536_v10 = vpop.f32.mrf.mxu0 }
 0x3e4   :  { %v1704_v59 = vmax.f32 %v1526_v45, %v1536_v10 }
 0x3e5   :  { %v1538_v33 = vpop.f32.mrf.mxu0 }
 0x3e6   :  { %v1684_v60 = vmax.f32 %v1528_v24, %v1538_v33 }
 0x3e7   :  { %v1540_v63 = vpop.f32.mrf.mxu0 }
 0x3e8   :  { %v1705_v52 = vmax.f32 %v1530_v32, %v1540_v63 }
 0x3e9   :  { %v1544_v58 = vpop.f32.mrf.mxu0 }
 0x3ea   :  { %v1685_v6 = vmax.f32 %v1683_v4, %v1544_v58 }
 0x3eb   :  { %v1546_v38 = vpop.f32.mrf.mxu0 }
 0x3ec   :  { %v1706_v44 = vmax.f32 %v1704_v59, %v1546_v38 }
 0x3ed   :  { %v1548_v26 = vpop.f32.mrf.mxu0 }
 0x3ee   :  { %v1686_v25 = vmax.f32 %v1684_v60, %v1548_v26 }
 0x3ef   :  { %v1550_v56 = vpop.f32.mrf.mxu0 }
 0x3f0   :  { %v1707_v27 = vmax.f32 %v1705_v52, %v1550_v56 }
 0x3f1   :  { %v1554_v1 = vpop.f32.mrf.mxu0 }
 0x3f2   :  { %v1687_v22 = vmax.f32 %v1685_v6, %v1554_v1 }
 0x3f3   :  { %v1556_v16 = vpop.f32.mrf.mxu0 }
 0x3f4   :  { %v1708_v18 = vmax.f32 %v1706_v44, %v1556_v16 }
 0x3f5   :  { %v1558_v55 = vpop.f32.mrf.mxu0 }
 0x3f6   :  { %v1688_v46 = vmax.f32 %v1686_v25, %v1558_v55 }
 0x3f7   :  { %v1560_v0 = vpop.f32.mrf.mxu0 }
 0x3f8   :  { %v1709_v8 = vmax.f32 %v1707_v27, %v1560_v0 }
 0x3f9   :  { %v1564_v31 = vpop.f32.mrf.mxu0 }
 0x3fa   :  { %v1689_v24 = vmax.f32 %v1687_v22, %v1564_v31 }
 0x3fb   :  { %v1566_v29 = vpop.f32.mrf.mxu0 }
 0x3fc   :  { %v1710_v32 = vmax.f32 %v1708_v18, %v1566_v29 }
 0x3fd   :  { %v1568_v53 = vpop.f32.mrf.mxu0 }
 0x3ff   :  { %v1570_v11 = vpop.f32.mrf.mxu0 }
 0x401   :  { %v1574_v14 = vpop.f32.mrf.mxu0 }
 0x402   :  { %v1691_v51 = vmax.f32 %v1689_v24, %v1574_v14 }
 0x403   :  { %v1576_v17 = vpop.f32.mrf.mxu0 }
 0x404   :  { %v1712_v10 = vmax.f32 %v1710_v32, %v1576_v17 }
 0x405   :  { %v1578_v35 = vpop.f32.mrf.mxu0 }
 0x407   :  { %v1580_v48 = vpop.f32.mrf.mxu0 }
 0x409   :  { %v1584_v28 = vpop.f32.mrf.mxu0 }
 0x40a   :  { %v1693_v56 = vmax.f32 %v1691_v51, %v1584_v28 }
 0x40b   :  { %v1586_v34 = vpop.f32.mrf.mxu0 }
 0x40c   :  { %v1714_v55 = vmax.f32 %v1712_v10, %v1586_v34 }
 0x40d   :  { %v1588_v47 = vpop.f32.mrf.mxu0 }
 0x40f   :  { %v1590_v57 = vpop.f32.mrf.mxu0 }
 0x411   :  { %v2912_v13 = vpop.f32.mrf.mxu1  ;;  %v1594_v15 = vpop.f32.mrf.mxu0 }
 0x412   :  { %v1695_v22 = vmax.f32 %v1693_v56, %v1594_v15 }
 0x413   :  { %v2914_v37 = vpop.f32.mrf.mxu1  ;;  %v1596_v2 = vpop.f32.mrf.mxu0 }
 0x414   :  { %v1716_v31 = vmax.f32 %v1714_v55, %v1596_v2 }
 0x415   :  { %v2916_v23 = vpop.f32.mrf.mxu1  ;;  %v1598_v20 = vpop.f32.mrf.mxu0 }
 0x417   :  { %v2918_v40 = vpop.f32.mrf.mxu1  ;;  %v1600_v45 = vpop.f32.mrf.mxu0 }
 0x419   :  { %v2920_v36 = vpop.f32.mrf.mxu1 }
 0x41a   :  { %v1725_v16 = vmax.f32 %v2912_v13, %v2920_v36 }
 0x41b   :  { %v2922_v21 = vpop.f32.mrf.mxu1 }
 0x41d   :  { %v2924_v5 = vpop.f32.mrf.mxu1 }
 0x41e   :  { %v1726_v18 = vmax.f32 %v2916_v23, %v2924_v5 }
 0x41f   :  { %v2926_v41 = vpop.f32.mrf.mxu1 }
 0x421   :  { %v1624_v62 = vpop.f32.mrf.mxu1 }
 0x422   :  { %v1727_v14 = vmax.f32 %v1725_v16, %v1624_v62 }
 0x423   :  { %v1626_v30 = vpop.f32.mrf.mxu1 }
 0x425   :  { %v1628_v49 = vpop.f32.mrf.mxu1 }
 0x426   :  { %v1728_v17 = vmax.f32 %v1726_v18, %v1628_v49 }
 0x427   :  { %v1630_v50 = vpop.f32.mrf.mxu1 }
 0x429   :  { %v2928_v42 = vpop.f32.mrf.mxu1 }
 0x42a   :  { %v1729_v13 = vmax.f32 %v1727_v14, %v2928_v42  ;;  %v2979_v14 = vld [vmem:[#allocation8_spill] sm:$0xff] }
 0x42b   :  { %v2930_v54 = vpop.f32.mrf.mxu1 }
 0x42c   :  { %2973 = vst [vmem:[#allocation11_spill] sm:$0xff] %v2930_v54  ;;  %v1711_v54 = vmax.f32 %v1709_v8, %v1570_v11  ;;  %v1747_v11 = vmax.f32 %v2918_v40, %v2926_v41 }
 0x42d   :  { %v2932_v7 = vpop.f32.mrf.mxu1 }
 0x42e   :  { %2974 = vst [vmem:[#allocation12_spill] sm:$0xff] %v2932_v7  ;;  %v1713_v63 = vmax.f32 %v1711_v54, %v1580_v48  ;;  %v1749_v34 = vmax.f32 %v1747_v11, %v1630_v50 }
 0x42f   :  { %v2934_v61 = vpop.f32.mrf.mxu1 }
 0x430   :  { %2975 = vst [vmem:[#allocation13_spill] sm:$0xff] %v2934_v61  ;;  %v1690_v61 = vmax.f32 %v1688_v46, %v1568_v53  ;;  %v1715_v58 = vmax.f32 %v1713_v63, %v1590_v57  ;;  %v1746_v53 = vmax.f32 %v2914_v37, %v2922_v21 }
 0x431   :  { %v1644_v43 = vpop.f32.mrf.mxu1 }
 0x432   :  { %v1692_v33 = vmax.f32 %v1690_v61, %v1578_v35  ;;  %v1717_v60 = vmax.f32 %v1715_v58, %v1600_v45  ;;  %v1748_v28 = vmax.f32 %v1746_v53, %v1626_v30  ;;  %v1731_v37 = vmax.f32 %v1729_v13, %v1644_v43 }
 0x433   :  { %v1646_v3 = vpop.f32.mrf.mxu1  ;;  %v2327_v58 = vmov 1983009808  }
 0x434   :  { %v1694_v26 = vmax.f32 %v1692_v33, %v1588_v47  ;;  %v1718_v35 = vmax.f32 %v1716_v31, %v1717_v60  ;;  %v2977_v47 = vld [vmem:[#allocation11_spill] sm:$0xff] }
 0x435   :  { %v1648_v39 = vpop.f32.mrf.mxu1  ;;  %v2976_v36 = vld [vmem:[#allocation12_spill] sm:$0xff]  ;;  %v1750_v54 = vmax.f32 %v1748_v28, %v2977_v47 }
 0x436   :  { %v1696_v0 = vmax.f32 %v1694_v26, %v1598_v20  ;;  %v1730_v23 = vmax.f32 %v1728_v17, %v2976_v36  ;;  %v1719_v40 = vrot.slane %v1718_v35, 4  ;;  %v2980_v36 = vld [vmem:[#allocation10_spill] sm:$0xff] }
 0x437   :  { %v1650_v12 = vpop.f32.mrf.mxu1  ;;  %v2978_v57 = vld [vmem:[#allocation13_spill] sm:$0xff]  ;;  %v1752_v62 = vmax.f32 %v1750_v54, %v1646_v3 }
 0x438   :  { %v1697_v20 = vmax.f32 %v1695_v22, %v1696_v0  ;;  %v1751_v61 = vmax.f32 %v1749_v34, %v2978_v57  ;;  %v1732_v21 = vmax.f32 %v1730_v23, %v1648_v39  ;;  %v1720_v27 = vmax.f32 %v1718_v35, %v1719_v40  ;;  %v1775_v34 = vld [vmem:[#allocation5] sm:$0xf] }
 0x439   :  { %v1654_v9 = vpop.f32.mrf.mxu1 }
 0x43a   :  { %v1698_v15 = vrot.slane %v1697_v20, 4  ;;  %v1753_v49 = vmax.f32 %v1751_v61, %v1650_v12  ;;  %v1733_v52 = vmax.f32 %v1731_v37, %v1654_v9  ;;  %v1721_v12 = vrot.slane %v1720_v27, 2 }
 0x43b   :  { %v1656_v7 = vpop.f32.mrf.mxu1 }
 0x43c   :  { %v1754_v50 = vmax.f32 %v1752_v62, %v1656_v7  ;;  %v1699_v25 = vmax.f32 %v1697_v20, %v1698_v15  ;;  %v1722_v51 = vmax.f32 %v1720_v27, %v1721_v12 }
 0x43d   :  { %v1658_v19 = vpop.f32.mrf.mxu1 }
 0x43e   :  { %v1734_v2 = vmax.f32 %v1732_v21, %v1658_v19  ;;  %v1700_v3 = vrot.slane %v1699_v25, 2  ;;  %v1723_v60 = vrot.slane %v1722_v51, 1 }
 0x43f   :  { %v1660_v38 = vpop.f32.mrf.mxu1 }
 0x440   :  { %v1755_v4 = vmax.f32 %v1753_v49, %v1660_v38  ;;  %v1701_v45 = vmax.f32 %v1699_v25, %v1700_v3  ;;  %v1780_v38 = vunpack.c.l.s4 %v2327_v58  ;;  %v1724_v53 = vmax.f32 %v1722_v51, %v1723_v60 }
 0x441   :  { %v1664_v1 = vpop.f32.mrf.mxu1 }
 0x442   :  { %v1735_v42 = vmax.f32 %v1733_v52, %v1664_v1  ;;  %v1702_v0 = vrot.slane %v1701_v45, 1  ;;  %v1781_v18 = vunpack.c.0.s8 %v1780_v38 }
 0x443   :  { %v1666_v29 = vpop.f32.mrf.mxu1 }
 0x444   :  { %v1756_v44 = vmax.f32 %v1754_v50, %v1666_v29  ;;  %v1703_v29 = vmax.f32 %v1701_v45, %v1702_v0  ;;  %v1784_v17 = vsub.s32 %v1781_v18, %v2979_v14 }
 0x445   :  { %v1668_v48 = vpop.f32.mrf.mxu1 }
 0x446   :  { %v1736_v59 = vmax.f32 %v1734_v2, %v1668_v48  ;;  %v1793_v48 = vld [vmem:[%s2965_s8] sm:$0x3] }
 0x447   :  { %v1670_v5 = vpop.f32.mrf.mxu1  ;;  %v1798_v23 = vrot.slane %v1793_v48, %v2980_v36 }
 0x448   :  { %v1757_v46 = vmax.f32 %v1755_v4, %v1670_v5  ;;  %v2981_v5 = vld [vmem:[#allocation9_spill] sm:$0xff] }
 0x449   :  { %v1674_v41 = vpop.f32.mrf.mxu1  ;;  %v1802_v47 = vrot.slane %v1793_v48, %v2981_v5 }
 0x44a   :  { %v1737_v8 = vmax.f32 %v1735_v42, %v1674_v41 }
 0x44b   :  { %v1676_v30 = vpop.f32.mrf.mxu1  ;;  %v1803_v57 = vcombine.low %v1798_v23, %v1802_v47 }
 0x44c   :  { %v1758_v24 = vmax.f32 %v1756_v44, %v1676_v30 }
 0x44d   :  { %v1678_v6 = vpop.f32.mrf.mxu1  ;;  %v1810_v61 = vrot.slane %v1803_v57, %v1784_v17 }
 0x44e   :  { %v1738_v43 = vmax.f32 %v1736_v59, %v1678_v6 }
 0x44f   :  { %v1680_v39 = vpop.f32.mrf.mxu1 }
 0x450   :  { %v1739_v32 = vmax.f32 %v1737_v8, %v1738_v43  ;;  %v1759_v33 = vmax.f32 %v1757_v46, %v1680_v39 }
 0x452   :  { %v1740_v9 = vrot.slane %v1739_v32, 4  ;;  %v1760_v63 = vmax.f32 %v1758_v24, %v1759_v33 }
 0x454   :  { %v1741_v19 = vmax.f32 %v1739_v32, %v1740_v9  ;;  %v1761_v7 = vrot.slane %v1760_v63, 4 }
 0x456   :  { %v1742_v10 = vrot.slane %v1741_v19, 2  ;;  %v1762_v26 = vmax.f32 %v1760_v63, %v1761_v7 }
 0x458   :  { %v1743_v56 = vmax.f32 %v1741_v19, %v1742_v10  ;;  %v1763_v55 = vrot.slane %v1762_v26, 2 }
 0x45a   :  { %v1744_v1 = vrot.slane %v1743_v56, 1  ;;  %v1764_v16 = vmax.f32 %v1762_v26, %v1763_v55 }
 0x45c   :  { %v1745_v22 = vmax.f32 %v1743_v56, %v1744_v1  ;;  %v1765_v31 = vrot.slane %v1764_v16, 1 }
 0x45e   :  { %v1766_v11 = vmax.f32 %v1764_v16, %v1765_v31  ;;  %v1768_v20 = vsel %vm1767_vm1, %v1703_v29, %v1745_v22 }
 0x460   :  { %v1769_v35 = vsel %vm1767_vm1, %v1724_v53, %v1766_v11 }
 0x461   :  { %v1778_v28 = vcombine.low %v1768_v20, %v1769_v35 }
 0x463   :  { %v1785_v13 = vrot.slane %v1778_v28, %v1784_v17 }
 0x465   :  { %v1787_v54 = vmax.f32 %v1775_v34, %v1785_v13 }
 0x467   :  { %1788 = vst [vmem:[#allocation5] sm:$0xf] %v1787_v54 }
 0x46e   :  { %v1792_v37 = vld [vmem:[#allocation5] sm:$0xf] }
 0x46f   :  { %v1812_v21 = vadd.f32 %v1810_v61, %v1792_v37 }
 0x471   :  { %1813 = vst [vmem:[#allocation5] sm:$0xf] %v1812_v21 }
 0x472   :  { %2307 = shalt.err (!%p2304_p9)
}
 0x473   :  { %1823 = dma.vmem_to_hbm [thread:$0]  %s1821_s1, 64, %s2966_s9, [#allocation4]  }
 0x474   :  { %2318 = dma.done.wait [#allocation4], 64  }
 0x475   :  { %2319 = vsyncadd [#allocation4], 4294967232 }
 0x476   :  { %1827 = vsyncpa [#allocation3], 1 }
 0x477   :  { %1828 = vsyncpa [#allocation4], 1 }

</bundles_post_ra>
